<compile_context>
chip_gen: v7x
topology: tpu7x:2x2x1
jax: 0.10.0
libtpu: 0.0.40
codegen_flags: <defaults>
</compile_context>

<pallas_src>
import functools

import jax
import jax.numpy as jnp
from jax.experimental import pallas as pl
from jax.experimental.pallas import tpu as pltpu


# ---------------------------------------------------------------------------
# Kernel: fused 6-layer MLP applied column-wise to a (256, bL) tile.
# ---------------------------------------------------------------------------
def _ae_kernel(x_ref, w1_ref, wmid_ref, w6_ref, b15_ref, b6_ref, o_ref):
    x = x_ref[0].astype(jnp.float32)                                # (256, bL)

    # Layer 1: 256 -> 128 (+ ReLU)
    h = jnp.dot(w1_ref[...], x, preferred_element_type=jnp.float32) + b15_ref[0]
    h = jnp.maximum(h, 0.0)

    # Layers 2..5 (padded to 128x128 each), all followed by ReLU.
    for j in range(4):
        h = jnp.dot(wmid_ref[j], h,
                    preferred_element_type=jnp.float32) + b15_ref[j + 1]
        h = jnp.maximum(h, 0.0)

    # Layer 6: 128 -> 256, no ReLU.
    y = jnp.dot(w6_ref[...], h, preferred_element_type=jnp.float32) + b6_ref[...]
    o_ref[0] = y.astype(o_ref.dtype)


# ---------------------------------------------------------------------------
# pallas_call wrapper over the (B, 256, L) view.
# ---------------------------------------------------------------------------
def _run_ae(x3, packed, *, block_l=1024):
    b, feat, l = x3.shape
    assert feat == 256, "AutoencoderModel expects 256 features"
    w1p, wmid, w6p, b15, b6p = packed

    # Lane-tile: full L when small (always legal), otherwise a multiple of 128
    # so ragged edge blocks stay legal and are masked by Pallas.
    cand = max(128, (block_l // 128) * 128)
    bl = l if l <= cand else cand
    grid = (b, pl.cdiv(l, bl))

    true_flops = 2 * 82432 * b * l                      # unpadded MLP flops
    bytes_accessed = 2 * b * feat * l * 4 + sum(int(a.size) * 4 for a in packed)

    return pl.pallas_call(
        _ae_kernel,
        out_shape=jax.ShapeDtypeStruct((b, feat, l), x3.dtype),
        grid_spec=pltpu.PrefetchScalarGridSpec(
            num_scalar_prefetch=0,
            grid=grid,
            in_specs=[
                pl.BlockSpec((1, feat, bl), lambda i, j: (i, 0, j)),   # x tile
                pl.BlockSpec(w1p.shape, lambda i, j: (0, 0)),          # W1
                pl.BlockSpec(wmid.shape, lambda i, j: (0, 0, 0)),      # W2..W5
                pl.BlockSpec(w6p.shape, lambda i, j: (0, 0)),          # W6
                pl.BlockSpec(b15.shape, lambda i, j: (0, 0, 0)),       # b1..b5
                pl.BlockSpec(b6p.shape, lambda i, j: (0, 0)),          # b6
            ],
            out_specs=pl.BlockSpec((1, feat, bl), lambda i, j: (i, 0, j)),
        ),
        compiler_params=pltpu.CompilerParams(
            dimension_semantics=("parallel", "parallel")),
        cost_estimate=pl.CostEstimate(
            flops=true_flops, transcendentals=0, bytes_accessed=bytes_accessed),
    )(x3, w1p, wmid, w6p, b15, b6p)


# ---------------------------------------------------------------------------
# Forward with the module's reshape semantics (no transposes needed: the
# kernel consumes the native (B, 256, L) layout directly).
# ---------------------------------------------------------------------------
def autoencoder_forward(x, packed_params, *, block_l=1024):
    orig_shape = x.shape
    b, last = orig_shape[0], orig_shape[-1]
    x3 = jnp.reshape(x, (b, -1, last))          # (B, 256, L) -- free reshape
    y3 = _run_ae(x3, packed_params, block_l=block_l)
    return jnp.reshape(y3, orig_shape)


# ---------------------------------------------------------------------------
# Parameters: torch convention (weight (out, in), bias (out,)) + packing.
# ---------------------------------------------------------------------------
_DIMS = [(256, 128), (128, 64), (64, 4),        # encoder
         (4, 64), (64, 128), (128, 256)]        # decoder  (in, out)


def init_params(key):
    params = []
    for i, (din, dout) in enumerate(_DIMS):
        kw, kb = jax.random.split(jax.random.fold_in(key, i))
        bound = 1.0 / (din ** 0.5)
        w = jax.random.uniform(kw, (dout, din), jnp.float32, -bound, bound)
        bv = jax.random.uniform(kb, (dout,), jnp.float32, -bound, bound)
        params.append((w, bv))
    return params


def pack_params(params):
    """Zero-pad narrow layers to 128 and pack 12 tensors into 5 arrays.

    Exact: padded output rows have zero weight rows and zero bias (=> 0 after
    ReLU), and the following layer has zero weight columns at padded inputs.
    """
    def pad_w(w, out_p, in_p):
        o, i = w.shape
        return jnp.pad(w, ((0, out_p - o), (0, in_p - i)))

    def pad_b(bv, out_p):
        return jnp.pad(bv, (0, out_p - bv.shape[0])).reshape(out_p, 1)

    (w1, b1), (w2, b2), (w3, b3), (w4, b4), (w5, b5), (w6, b6) = params
    w1p = pad_w(w1, 128, 256)                               # (128, 256)
    wmid = jnp.stack([pad_w(w2, 128, 128), pad_w(w3, 128, 128),
                      pad_w(w4, 128, 128), pad_w(w5, 128, 128)])  # (4,128,128)
    w6p = pad_w(w6, 256, 128)                               # (256, 128)
    b15 = jnp.stack([pad_b(b1, 128), pad_b(b2, 128), pad_b(b3, 128),
                     pad_b(b4, 128), pad_b(b5, 128)])       # (5, 128, 1)
    b6p = pad_b(b6, 256)                                    # (256, 1)
    return (w1p, wmid, w6p, b15, b6p)


# ---------------------------------------------------------------------------
# Pure-JAX reference mirroring the PyTorch forward exactly (with transposes).
# ---------------------------------------------------------------------------
def _reference_forward(x, params):
    orig_shape = x.shape
    b, last = orig_shape[0], orig_shape[-1]
    h = jnp.reshape(jnp.transpose(jnp.reshape(x, (b, -1, last)), (0, 2, 1)),
                    (-1, 256))
    for i, (w, bv) in enumerate(params):
        h = h @ w.T + bv
        if i != len(params) - 1:
            h = jnp.maximum(h, 0.0)
    y = jnp.transpose(jnp.reshape(h, (b, last, -1)), (0, 2, 1))
    return jnp.reshape(y, orig_shape)


if __name__ == "__main__":
    key = jax.random.PRNGKey(0)
    params = init_params(jax.random.fold_in(key, 1000))
    packed = pack_params(params)

    # Small input consistent with the module: (batch=2, features=256, seq=8).
    x = jax.random.normal(key, (2, 256, 8), dtype=jnp.float32)

    fwd = jax.jit(functools.partial(autoencoder_forward, packed_params=packed))
    y = fwd(x)
    jax.block_until_ready(y)

    y_ref = _reference_forward(x, params)
    assert y.shape == x.shape
    assert jnp.allclose(y, y_ref, atol=1e-4, rtol=1e-4), \
        float(jnp.max(jnp.abs(y - y_ref)))

    print("KERNEL_OK")
</pallas_src>

<mosaic_0001>
module attributes {stable_mosaic.version = 11 : i64} {
  func.func @_ae_kernel(%arg0: i32, %arg1: i32, %arg2: memref<1x256x8xf32, #tpu.memory_space<vmem>>, %arg3: memref<128x256xf32, #tpu.memory_space<vmem>>, %arg4: memref<4x128x128xf32, #tpu.memory_space<vmem>>, %arg5: memref<256x128xf32, #tpu.memory_space<vmem>>, %arg6: memref<5x128x1xf32, #tpu.memory_space<vmem>>, %arg7: memref<256x1xf32, #tpu.memory_space<vmem>>, %arg8: memref<1x256x8xf32, #tpu.memory_space<vmem>>) attributes {dimension_semantics = [#tpu.dimension_semantics<parallel>, #tpu.dimension_semantics<parallel>], iteration_bounds = array<i64: 2, 1>, scalar_prefetch = 0 : i64, scratch_operands = 0 : i64, tpu.core_type = #tpu.core_type<tc>, window_params = [{transform_indices = @transform_0, window_bounds = array<i64: 1, 256, 8>}, {pipeline_mode = #tpu.pipeline_mode<synchronous>, transform_indices = @transform_1, window_bounds = array<i64: 128, 256>}, {pipeline_mode = #tpu.pipeline_mode<synchronous>, transform_indices = @transform_2, window_bounds = array<i64: 4, 128, 128>}, {pipeline_mode = #tpu.pipeline_mode<synchronous>, transform_indices = @transform_3, window_bounds = array<i64: 256, 128>}, {pipeline_mode = #tpu.pipeline_mode<synchronous>, transform_indices = @transform_4, window_bounds = array<i64: 5, 128, 1>}, {pipeline_mode = #tpu.pipeline_mode<synchronous>, transform_indices = @transform_5, window_bounds = array<i64: 256, 1>}, {transform_indices = @transform_6, window_bounds = array<i64: 1, 256, 8>}]} {
    %c0 = arith.constant 0 : index
    %c0_0 = arith.constant 0 : index
    %c0_1 = arith.constant 0 : index
    %0 = vector.load %arg2[%c0, %c0_0, %c0_1] : memref<1x256x8xf32, #tpu.memory_space<vmem>>, vector<1x256x8xf32>
    %1 = vector.shape_cast %0 : vector<1x256x8xf32> to vector<256x8xf32>
    %c0_2 = arith.constant 0 : index
    %c0_3 = arith.constant 0 : index
    %2 = vector.load %arg3[%c0_2, %c0_3] : memref<128x256xf32, #tpu.memory_space<vmem>>, vector<128x256xf32>
    %cst = arith.constant dense<0.000000e+00> : vector<128x8xf32>
    %3 = tpu.matmul %2, %1, %cst {dimension_numbers = #tpu.dot_dimension_numbers<[1], [0], [0], [1], [0, 0, 1, 1], [], []>} : vector<128x256xf32>, vector<256x8xf32>, vector<128x8xf32> -> vector<128x8xf32>
    %c0_4 = arith.constant 0 : index
    %c0_5 = arith.constant 0 : index
    %c0_6 = arith.constant 0 : index
    %4 = vector.load %arg6[%c0_4, %c0_5, %c0_6] : memref<5x128x1xf32, #tpu.memory_space<vmem>>, vector<1x128x1xf32>
    %5 = vector.shape_cast %4 : vector<1x128x1xf32> to vector<128x1xf32>
    %6 = vector.broadcast %5 : vector<128x1xf32> to vector<128x8xf32>
    %7 = arith.addf %3, %6 : vector<128x8xf32>
    %cst_7 = arith.constant 0.000000e+00 : f32
    %8 = vector.broadcast %cst_7 : f32 to vector<128x8xf32>
    %9 = arith.maximumf %7, %8 : vector<128x8xf32>
    %c0_8 = arith.constant 0 : index
    %c0_9 = arith.constant 0 : index
    %c0_10 = arith.constant 0 : index
    %10 = vector.load %arg4[%c0_8, %c0_9, %c0_10] : memref<4x128x128xf32, #tpu.memory_space<vmem>>, vector<1x128x128xf32>
    %11 = vector.shape_cast %10 : vector<1x128x128xf32> to vector<128x128xf32>
    %cst_11 = arith.constant dense<0.000000e+00> : vector<128x8xf32>
    %12 = tpu.matmul %11, %9, %cst_11 {dimension_numbers = #tpu.dot_dimension_numbers<[1], [0], [0], [1], [0, 0, 1, 1], [], []>} : vector<128x128xf32>, vector<128x8xf32>, vector<128x8xf32> -> vector<128x8xf32>
    %c1 = arith.constant 1 : index
    %c0_12 = arith.constant 0 : index
    %c0_13 = arith.constant 0 : index
    %13 = vector.load %arg6[%c1, %c0_12, %c0_13] : memref<5x128x1xf32, #tpu.memory_space<vmem>>, vector<1x128x1xf32>
    %14 = vector.shape_cast %13 : vector<1x128x1xf32> to vector<128x1xf32>
    %15 = vector.broadcast %14 : vector<128x1xf32> to vector<128x8xf32>
    %16 = arith.addf %12, %15 : vector<128x8xf32>
    %cst_14 = arith.constant 0.000000e+00 : f32
    %17 = vector.broadcast %cst_14 : f32 to vector<128x8xf32>
    %18 = arith.maximumf %16, %17 : vector<128x8xf32>
    %c1_15 = arith.constant 1 : index
    %c0_16 = arith.constant 0 : index
    %c0_17 = arith.constant 0 : index
    %19 = vector.load %arg4[%c1_15, %c0_16, %c0_17] : memref<4x128x128xf32, #tpu.memory_space<vmem>>, vector<1x128x128xf32>
    %20 = vector.shape_cast %19 : vector<1x128x128xf32> to vector<128x128xf32>
    %cst_18 = arith.constant dense<0.000000e+00> : vector<128x8xf32>
    %21 = tpu.matmul %20, %18, %cst_18 {dimension_numbers = #tpu.dot_dimension_numbers<[1], [0], [0], [1], [0, 0, 1, 1], [], []>} : vector<128x128xf32>, vector<128x8xf32>, vector<128x8xf32> -> vector<128x8xf32>
    %c2 = arith.constant 2 : index
    %c0_19 = arith.constant 0 : index
    %c0_20 = arith.constant 0 : index
    %22 = vector.load %arg6[%c2, %c0_19, %c0_20] : memref<5x128x1xf32, #tpu.memory_space<vmem>>, vector<1x128x1xf32>
    %23 = vector.shape_cast %22 : vector<1x128x1xf32> to vector<128x1xf32>
    %24 = vector.broadcast %23 : vector<128x1xf32> to vector<128x8xf32>
    %25 = arith.addf %21, %24 : vector<128x8xf32>
    %cst_21 = arith.constant 0.000000e+00 : f32
    %26 = vector.broadcast %cst_21 : f32 to vector<128x8xf32>
    %27 = arith.maximumf %25, %26 : vector<128x8xf32>
    %c2_22 = arith.constant 2 : index
    %c0_23 = arith.constant 0 : index
    %c0_24 = arith.constant 0 : index
    %28 = vector.load %arg4[%c2_22, %c0_23, %c0_24] : memref<4x128x128xf32, #tpu.memory_space<vmem>>, vector<1x128x128xf32>
    %29 = vector.shape_cast %28 : vector<1x128x128xf32> to vector<128x128xf32>
    %cst_25 = arith.constant dense<0.000000e+00> : vector<128x8xf32>
    %30 = tpu.matmul %29, %27, %cst_25 {dimension_numbers = #tpu.dot_dimension_numbers<[1], [0], [0], [1], [0, 0, 1, 1], [], []>} : vector<128x128xf32>, vector<128x8xf32>, vector<128x8xf32> -> vector<128x8xf32>
    %c3 = arith.constant 3 : index
    %c0_26 = arith.constant 0 : index
    %c0_27 = arith.constant 0 : index
    %31 = vector.load %arg6[%c3, %c0_26, %c0_27] : memref<5x128x1xf32, #tpu.memory_space<vmem>>, vector<1x128x1xf32>
    %32 = vector.shape_cast %31 : vector<1x128x1xf32> to vector<128x1xf32>
    %33 = vector.broadcast %32 : vector<128x1xf32> to vector<128x8xf32>
    %34 = arith.addf %30, %33 : vector<128x8xf32>
    %cst_28 = arith.constant 0.000000e+00 : f32
    %35 = vector.broadcast %cst_28 : f32 to vector<128x8xf32>
    %36 = arith.maximumf %34, %35 : vector<128x8xf32>
    %c3_29 = arith.constant 3 : index
    %c0_30 = arith.constant 0 : index
    %c0_31 = arith.constant 0 : index
    %37 = vector.load %arg4[%c3_29, %c0_30, %c0_31] : memref<4x128x128xf32, #tpu.memory_space<vmem>>, vector<1x128x128xf32>
    %38 = vector.shape_cast %37 : vector<1x128x128xf32> to vector<128x128xf32>
    %cst_32 = arith.constant dense<0.000000e+00> : vector<128x8xf32>
    %39 = tpu.matmul %38, %36, %cst_32 {dimension_numbers = #tpu.dot_dimension_numbers<[1], [0], [0], [1], [0, 0, 1, 1], [], []>} : vector<128x128xf32>, vector<128x8xf32>, vector<128x8xf32> -> vector<128x8xf32>
    %c4 = arith.constant 4 : index
    %c0_33 = arith.constant 0 : index
    %c0_34 = arith.constant 0 : index
    %40 = vector.load %arg6[%c4, %c0_33, %c0_34] : memref<5x128x1xf32, #tpu.memory_space<vmem>>, vector<1x128x1xf32>
    %41 = vector.shape_cast %40 : vector<1x128x1xf32> to vector<128x1xf32>
    %42 = vector.broadcast %41 : vector<128x1xf32> to vector<128x8xf32>
    %43 = arith.addf %39, %42 : vector<128x8xf32>
    %cst_35 = arith.constant 0.000000e+00 : f32
    %44 = vector.broadcast %cst_35 : f32 to vector<128x8xf32>
    %45 = arith.maximumf %43, %44 : vector<128x8xf32>
    %c0_36 = arith.constant 0 : index
    %c0_37 = arith.constant 0 : index
    %46 = vector.load %arg5[%c0_36, %c0_37] : memref<256x128xf32, #tpu.memory_space<vmem>>, vector<256x128xf32>
    %cst_38 = arith.constant dense<0.000000e+00> : vector<256x8xf32>
    %47 = tpu.matmul %46, %45, %cst_38 {dimension_numbers = #tpu.dot_dimension_numbers<[1], [0], [0], [1], [0, 0, 1, 1], [], []>} : vector<256x128xf32>, vector<128x8xf32>, vector<256x8xf32> -> vector<256x8xf32>
    %c0_39 = arith.constant 0 : index
    %c0_40 = arith.constant 0 : index
    %48 = vector.load %arg7[%c0_39, %c0_40] : memref<256x1xf32, #tpu.memory_space<vmem>>, vector<256x1xf32>
    %49 = vector.broadcast %48 : vector<256x1xf32> to vector<256x8xf32>
    %50 = arith.addf %47, %49 : vector<256x8xf32>
    %c0_41 = arith.constant 0 : index
    %c0_42 = arith.constant 0 : index
    %c0_43 = arith.constant 0 : index
    %51 = vector.load %arg8[%c0_41, %c0_42, %c0_43] : memref<1x256x8xf32, #tpu.memory_space<vmem>>, vector<1x256x8xf32>
    %52 = vector.shape_cast %51 : vector<1x256x8xf32> to vector<256x8xf32>
    %53 = vector.shape_cast %50 : vector<256x8xf32> to vector<1x256x8xf32>
    tpu.vector_store %arg8[%c0_41, %c0_42, %c0_43], %53 {strides = array<i32>} : memref<1x256x8xf32, #tpu.memory_space<vmem>>, vector<1x256x8xf32>,
    return
  }
  func.func @transform_0(%arg0: i32, %arg1: i32) -> (i32, i32, i32) {
    %c0_i32 = arith.constant 0 : i32
    %c0_i32_0 = arith.constant 0 : i32
    return %arg0, %c0_i32, %arg1 : i32, i32, i32
  }
  func.func @transform_1(%arg0: i32, %arg1: i32) -> (i32, i32) {
    %c0_i32 = arith.constant 0 : i32
    %c0_i32_0 = arith.constant 0 : i32
    %c0_i32_1 = arith.constant 0 : i32
    return %c0_i32, %c0_i32_0 : i32, i32
  }
  func.func @transform_2(%arg0: i32, %arg1: i32) -> (i32, i32, i32) {
    %c0_i32 = arith.constant 0 : i32
    %c0_i32_0 = arith.constant 0 : i32
    %c0_i32_1 = arith.constant 0 : i32
    %c0_i32_2 = arith.constant 0 : i32
    return %c0_i32, %c0_i32_0, %c0_i32_1 : i32, i32, i32
  }
  func.func @transform_3(%arg0: i32, %arg1: i32) -> (i32, i32) {
    %c0_i32 = arith.constant 0 : i32
    %c0_i32_0 = arith.constant 0 : i32
    %c0_i32_1 = arith.constant 0 : i32
    return %c0_i32, %c0_i32_0 : i32, i32
  }
  func.func @transform_4(%arg0: i32, %arg1: i32) -> (i32, i32, i32) {
    %c0_i32 = arith.constant 0 : i32
    %c0_i32_0 = arith.constant 0 : i32
    %c0_i32_1 = arith.constant 0 : i32
    %c0_i32_2 = arith.constant 0 : i32
    return %c0_i32, %c0_i32_0, %c0_i32_1 : i32, i32, i32
  }
  func.func @transform_5(%arg0: i32, %arg1: i32) -> (i32, i32) {
    %c0_i32 = arith.constant 0 : i32
    %c0_i32_0 = arith.constant 0 : i32
    %c0_i32_1 = arith.constant 0 : i32
    return %c0_i32, %c0_i32_0 : i32, i32
  }
  func.func @transform_6(%arg0: i32, %arg1: i32) -> (i32, i32, i32) {
    %c0_i32 = arith.constant 0 : i32
    %c0_i32_0 = arith.constant 0 : i32
    return %arg0, %c0_i32, %arg1 : i32, i32, i32
  }
}

</mosaic_0001>

<bundles_post_ra>
// kernel: autoencoder_forward.1
= control target key start
LH: loop header
LB: loop body
LE: loop exit
PB: predicated region body
PF: predicated region fallthrough
CT: control target
= control target key end

     0   :  { %11 = vsyncpa [#allocation3], 0  ;;  %s3962_s0 = inlined_call_operand.vmem [shape: f32[2,256,8], index: 0, kind: input, shape index: {}]   ;;  %s3963_s1 = inlined_call_operand.hbm [shape: f32[128,256], index: 1, kind: input, shape index: {}]   ;;  %s3964_s2 = inlined_call_operand.vmem [shape: f32[4,128,128], index: 2, kind: input, shape index: {}]   ;;  %s3965_s3 = inlined_call_operand.hbm [shape: f32[256,128], index: 3, kind: input, shape index: {}]   ;;  %s3966_s4 = inlined_call_operand.hbm [shape: f32[5,128,1], index: 4, kind: input, shape index: {}]   ;;  %s3967_s5 = inlined_call_operand.hbm [shape: f32[256,1], index: 5, kind: input, shape index: {}]   ;;  %s3968_s6 = inlined_call_operand.vmem [shape: f32[2,256,8], index: 6, kind: output, shape index: {}]  }
   0x1   :  { %12 = vsyncpa [#allocation5], 0 }
   0x2   :  { %13 = vsyncpa [#allocation8], 0  ;;  %s3470_s21 = smov 0   ;;  %s3472_s22 = smov 0  }
   0x3   :  { %s3474_s23 = smov 0  }
   0x4 LB: > { %s3426_s24 = smov [#allocation4]   ;;  %s2369_s26 = sadd.s32 4294967295, %s3424_s23   ;;  %s3424_s23 = sphi %s3474_s23, %s19_s23   ;;  %s3420_s22 = sphi %s3472_s22, %s3986_s22   ;;  %s3416_s21 = sphi %s3470_s21, %s3985_s21  }
   0x5   : > { %s225_s25 = sshll.u32 %s3426_s24, 4  ;;  %p2371_p0 = scmp.ge.s32.totalorder %s3424_s23, 1  ;;  %s3492_s25 = int_to_ptr.vmem [resolvable:$true] %s225_s25 }
   0x6   : > { %p197_p1 = scmp.lt.s32.totalorder %s3424_s23, 3  ;;  %p3488_p2 = scmp.eq.s32.totalorder %s2369_s26, 0 }
   0x7   : > { %s31_s30 = sadd.s32 1, %s3420_s22  ;;  %s3427_s8 = smov [#allocation2]  }
   0x8   : > { %s3976_s27 = scalar_select %p3488_p2, 1, 0 }
   0x9   : > { %p3494_p3 = pnand %p2371_p0, %p197_p1  ;;  %p3507_p6 = scmp.ge.s32.totalorder %s31_s30, 2 }
   0xa   : > { %s209_s9 = sshll.u32 %s3427_s8, 4  ;;  %s3278_s12 = scalar_lea.hbm %s3965_s3, 4096  ;;  %s210_s9 = int_to_ptr.vmem [resolvable:$true] %s209_s9 }
   0xb   : > { %s3977_s28 = scalar_select %p3494_p3, 1, 0 }
   0xc   : > { %p3222_p4 = pneg %p3494_p3  ;;  %p3279_p7 = scmp.ne.s32.totalorder %s3965_s3, %s3278_s12 }
   0xd   : > { %p3285_p11 = scmp.lt.u32.totalorder %s3278_s12, %s3965_s3 }
   0xe   : > { %p3502_p5 = pnand %p3488_p2, %p3222_p4 }
  0x10   : > { %p3519_p8 = pneg %p3502_p5 }
  0x12   : > { %p3281_p9 = pnand %p3519_p8, %p3279_p7 }
  0x14   : > { %p3282_p10 = pneg %p3281_p9 }
  0x16   : > { %p3287_p12 = pnand %p3285_p11, %p3282_p10 }
  0x18   : > { %3290 = shalt.err (!%p3287_p12)
}
  0x19   : > { %s3291_s18 = scalar_lea.vmem %s3492_s25, 4096  ;;  %p3299_p4 = scmp.lt.s32.totalorder %s3492_s25, %s3492_s25 }
  0x1a   : > { %p3292_p13 = scmp.ne.s32.totalorder %s3492_s25, %s3291_s18  ;;  %p3300_p2 = scmp.lt.s32.totalorder %s3291_s18, %s3291_s18 }
  0x1c   : > { %p3294_p0 = pnand %p3292_p13, %p3519_p8  ;;  %p3301_p7 = por %p3300_p2, %p3299_p4 }
  0x1e   : > { %p3295_p1 = pneg %p3294_p0 }
  0x20   : > { %p3302_p9 = pnand %p3301_p7, %p3295_p1 }
  0x22   : > { %3305 = shalt.err (!%p3302_p9)
}
  0x23   : > { %s3972_s19 = smov 128   ;;  %s3974_s20 = smov 8  }
  0x24   : > { %3228 = dma.hbm_to_vmem [thread:$0]  (!%p3502_p5), %s3965_s3, 4096, %s3492_s25, [#allocation5], %s3972_s19, %s3972_s19, %s3974_s20  }
  0x25   : > { %s3988_s30 = smov (%p3507_p6, %s31_s30), 0  ;;  %s3306_s11 = scalar_lea.hbm %s3963_s1, 4096 }
  0x26   : > { %p3307_p2 = scmp.ne.s32.totalorder %s3963_s1, %s3306_s11  ;;  %p3313_p12 = scmp.lt.u32.totalorder %s3306_s11, %s3963_s1 }
  0x28   : > { %p3309_p10 = pnand %p3307_p2, %p3519_p8 }
  0x2a   : > { %p3310_p11 = pneg %p3309_p10 }
  0x2c   : > { %p3315_p13 = pnand %p3313_p12, %p3310_p11 }
  0x2e   : > { %3318 = shalt.err (!%p3315_p13)
}
  0x2f   : > { %s3319_s25 = scalar_lea.vmem %s210_s9, 4096  ;;  %p3327_p4 = scmp.lt.s32.totalorder %s210_s9, %s210_s9 }
  0x30   : > { %p3320_p6 = scmp.ne.s32.totalorder %s210_s9, %s3319_s25  ;;  %p3328_p7 = scmp.lt.s32.totalorder %s3319_s25, %s3319_s25 }
  0x32   : > { %p3322_p0 = pnand %p3320_p6, %p3519_p8  ;;  %p3329_p9 = por %p3328_p7, %p3327_p4 }
  0x34   : > { %p3323_p1 = pneg %p3322_p0 }
  0x36   : > { %p3330_p3 = pnand %p3329_p9, %p3323_p1 }
  0x38   : > { %3333 = shalt.err (!%p3330_p3)
}
  0x39   : > { %s3430_s7 = smov 256   ;;  %s3431_s17 = smov 16  }
  0x3a   : > { %3225 = dma.hbm_to_vmem [thread:$0]  (!%p3502_p5), %s3963_s1, 4096, %s210_s9, [#allocation3], %s3430_s7, %s3430_s7, %s3431_s17  }
  0x3b   : > { %s3432_s26 = smov [#allocation6]   ;;  %s3433_s10 = smov [#allocation7]  }
  0x3c   : > { %s238_s8 = sshll.u32 %s3432_s26, 4  ;;  %s251_s11 = sshll.u32 %s3433_s10, 4  ;;  %s239_s8 = int_to_ptr.vmem [resolvable:$true] %s238_s8  ;;  %s252_s11 = int_to_ptr.vmem [resolvable:$true] %s251_s11 }
  0x3d   : > { %s3334_s14 = scalar_lea.hbm %s3966_s4, 10240 }
  0x3e   : > { %p3335_p3 = scmp.ne.s32.totalorder %s3966_s4, %s3334_s14  ;;  %p3341_p11 = scmp.lt.u32.totalorder %s3334_s14, %s3966_s4 }
  0x40   : > { %p3337_p2 = pnand %p3335_p3, %p3519_p8 }
  0x42   : > { %p3338_p10 = pneg %p3337_p2 }
  0x44   : > { %p3343_p12 = pnand %p3341_p11, %p3338_p10 }
  0x46   : > { %3346 = shalt.err (!%p3343_p12)
}
  0x47   : > { %s3347_s9 = scalar_lea.vmem %s239_s8, 10240  ;;  %p3355_p1 = scmp.lt.s32.totalorder %s239_s8, %s239_s8 }
  0x48   : > { %p3348_p13 = scmp.ne.s32.totalorder %s239_s8, %s3347_s9  ;;  %p3356_p4 = scmp.lt.s32.totalorder %s3347_s9, %s3347_s9 }
  0x4a   : > { %p3350_p6 = pnand %p3348_p13, %p3519_p8  ;;  %p3357_p7 = por %p3356_p4, %p3355_p1 }
  0x4c   : > { %p3351_p0 = pneg %p3350_p6 }
  0x4e   : > { %p3358_p9 = pnand %p3357_p7, %p3351_p0 }
  0x50   : > { %3361 = shalt.err (!%p3358_p9)
}
  0x51   : > { %s3981_s7 = smov 8   ;;  %s3982_s17 = smov 128  }
  0x52   : > { %3231 = dma.hbm_to_vmem [thread:$0]  (!%p3502_p5), %s3966_s4, 10240, %s239_s8, [#allocation5], %s3982_s17, %s3982_s17, %s3981_s7  }
  0x53   : > { %s3362_s26 = scalar_lea.hbm %s3967_s5, 4096 }
  0x54   : > { %p3363_p3 = scmp.ne.s32.totalorder %s3967_s5, %s3362_s26  ;;  %p3369_p11 = scmp.lt.u32.totalorder %s3362_s26, %s3967_s5 }
  0x56   : > { %p3365_p2 = pnand %p3363_p3, %p3519_p8 }
  0x58   : > { %p3366_p10 = pneg %p3365_p2 }
  0x5a   : > { %p3371_p12 = pnand %p3369_p11, %p3366_p10 }
  0x5c   : > { %3374 = shalt.err (!%p3371_p12)
}
  0x5d   : > { %s3375_s16 = scalar_lea.vmem %s252_s11, 4096  ;;  %p3383_p1 = scmp.lt.s32.totalorder %s252_s11, %s252_s11 }
  0x5e   : > { %p3376_p13 = scmp.ne.s32.totalorder %s252_s11, %s3375_s16  ;;  %p3384_p4 = scmp.lt.s32.totalorder %s3375_s16, %s3375_s16 }
  0x60   : > { %p3378_p6 = pnand %p3376_p13, %p3519_p8  ;;  %p3385_p7 = por %p3384_p4, %p3383_p1 }
  0x62   : > { %p3379_p0 = pneg %p3378_p6 }
  0x64   : > { %p3386_p9 = pnand %p3385_p7, %p3379_p0 }
  0x66   : > { %3389 = shalt.err (!%p3386_p9)
}
  0x67   : > { %3234 = dma.hbm_to_vmem [thread:$0]  (!%p3502_p5), %s3967_s5, 4096, %s252_s11, [#allocation8], %s3982_s17, %s3982_s17, %s3981_s7  }
  0x68   : > { %p3983_p3 = scmp.ne.s32.totalorder %s3977_s28, 0 }
  0x69   : > { %p3984_p8 = scmp.ne.s32.totalorder (!%p3983_p3), %s3976_s27, 0 }
  0x6a   : > { %278 = sbr.rel (%p3983_p3) target bundleno = 1707 (0x6ab), region = 44 }
  0x71   : > { %3403 = dma.done.wait (%p3984_p8), [#allocation3], 4096  }
  0x72   : > { %3405 = vsyncadd (%p3984_p8), [#allocation3], 4294963200 }
  0x73   : > { %3407 = dma.done.wait (%p3984_p8), [#allocation5], 14336  }
  0x74   : > { %3409 = vsyncadd (%p3984_p8), [#allocation5], 4294952960 }
  0x75   : > { %3411 = dma.done.wait (%p3984_p8), [#allocation8], 4096  }
  0x76   : > { %3413 = vsyncadd (%p3984_p8), [#allocation8], 4294963200  ;;  %p326_p5 = scmp.lt.s32.totalorder %s3416_s21, 1  ;;  %v3434_v0 = vmov 0   ;;  %v408_v1 = vld [vmem:[#allocation6 + $0x10] sm:$0xff]  ;;  %v406_v2 = vld [vmem:[#allocation6] sm:$0xff] }
  0x77   : > { %3277 = vset.pattern.permute.xlu1 %v3434_v0  ;;  %3276 = vset.pattern.permute.xlu0 %v3434_v0  ;;  %v409_v9 = vld [vmem:[#allocation6 + $0x18] sm:$0xff]  ;;  %v407_v10 = vld [vmem:[#allocation6 + $0x8] sm:$0xff]  ;;  %v410_v22 = vld [vmem:[#allocation6 + $0x20] sm:$0xff]  ;;  %vm2211_vm0 = vcmask 64512  }
  0x78   : > { %s3990_s21 = smov (!%p326_p5, %s3416_s21), 1  ;;  %434 = vperm.xlu1 %3277, %v408_v1   ;;  %424 = vperm.xlu0 %3276, %v406_v2   ;;  %v411_v21 = vld [vmem:[#allocation6 + $0x28] sm:$0xff]  ;;  %v413_v29 = vld [vmem:[#allocation6 + $0x38] sm:$0xff]  ;;  %v412_v30 = vld [vmem:[#allocation6 + $0x30] sm:$0xff] }
  0x79   : > { %s2436_s28 = sshll.u32 %s3990_s21, 8  ;;  %v415_v37 = vld [vmem:[#allocation6 + $0x48] sm:$0xff]  ;;  %v414_v38 = vld [vmem:[#allocation6 + $0x40] sm:$0xff]  ;;  %v417_v47 = vld [vmem:[#allocation6 + $0x58] sm:$0xff] }
  0x7a   : > { %s3631_s11 = scalar_lea.vmem %s3962_s0, %s2436_s28  ;;  %v375_v43 = vld [vmem:[#allocation2 + $0x8] sm:$0xff]  ;;  %v416_v48 = vld [vmem:[#allocation6 + $0x50] sm:$0xff]  ;;  %v418_v56 = vld [vmem:[#allocation6 + $0x60] sm:$0xff]  ;;  %s3887_s29 = scalar_lea.vmem %s3968_s6, %s2436_s28 }
  0x7b   : > { %v358_v3 = vld [vmem:[%s3631_s11 + $0x80] sm:$0xff]  ;;  %v359_v4 = vld [vmem:[%s3631_s11 + $0x88] sm:$0xff]  ;;  %v360_v11 = vld [vmem:[%s3631_s11 + $0x90] sm:$0xff]  ;;  %566 = vmatprep.mubr.f32.mxu0 %v375_v43 }
  0x7c   : > { %v342_v5 = vld [vmem:[%s3631_s11] sm:$0xff]  ;;  %v343_v6 = vld [vmem:[%s3631_s11 + $0x8] sm:$0xff]  ;;  %v2998_v7 = vpack.c.bf16 %v359_v4, %v358_v3  ;;  %v361_v12 = vld [vmem:[%s3631_s11 + $0x98] sm:$0xff]  ;;  %439 = vperm.xlu1 %3277, %v409_v9   ;;  %429 = vperm.xlu0 %3276, %v407_v10  }
  0x7d   : > { %v3000_v8 = vpack.c.bf16 %v343_v6, %v342_v5  ;;  %v344_v13 = vld [vmem:[%s3631_s11 + $0x10] sm:$0xff]  ;;  %v345_v14 = vld [vmem:[%s3631_s11 + $0x18] sm:$0xff]  ;;  %v3002_v15 = vpack.c.bf16 %v361_v12, %v360_v11  ;;  %v362_v16 = vld [vmem:[%s3631_s11 + $0xa0] sm:$0xff] }
  0x7e   : > { %2999 = vmatprep.subr.bf16.mxu0 %v2998_v7  ;;  %3190 = vmatprep.subr.bf16.mxu1 %v2998_v7  ;;  %v3004_v17 = vpack.c.bf16 %v345_v14, %v344_v13  ;;  %v363_v18 = vld [vmem:[%s3631_s11 + $0xa8] sm:$0xff]  ;;  %v346_v19 = vld [vmem:[%s3631_s11 + $0x20] sm:$0xff]  ;;  %v364_v24 = vld [vmem:[%s3631_s11 + $0xb0] sm:$0xff] }
  0x7f   : > { %3001 = vmatpush3.bf16.msra.mxu0 %v3000_v8  ;;  %3198 = vmatpush3.bf16.msra.mxu1 %v3000_v8  ;;  %v347_v20 = vld [vmem:[%s3631_s11 + $0x28] sm:$0xff]  ;;  %v3006_v23 = vpack.c.bf16 %v363_v18, %v362_v16  ;;  %v365_v25 = vld [vmem:[%s3631_s11 + $0xb8] sm:$0xff]  ;;  %v348_v27 = vld [vmem:[%s3631_s11 + $0x30] sm:$0xff] }
  0x80   : > { %3003 = vmatprep.subr.bf16.mxu0 %v3002_v15  ;;  %3191 = vmatprep.subr.bf16.mxu1 %v3002_v15  ;;  %v3008_v26 = vpack.c.bf16 %v347_v20, %v346_v19  ;;  %v349_v28 = vld [vmem:[%s3631_s11 + $0x38] sm:$0xff]  ;;  %v3010_v31 = vpack.c.bf16 %v365_v25, %v364_v24  ;;  %v366_v32 = vld [vmem:[%s3631_s11 + $0xc0] sm:$0xff]  ;;  %v367_v33 = vld [vmem:[%s3631_s11 + $0xc8] sm:$0xff] }
  0x81   : > { %449 = vperm.xlu1 %3277, %v411_v21   ;;  %444 = vperm.xlu0 %3276, %v410_v22   ;;  %v3012_v34 = vpack.c.bf16 %v349_v28, %v348_v27  ;;  %v350_v35 = vld [vmem:[%s3631_s11 + $0x40] sm:$0xff]  ;;  %v351_v36 = vld [vmem:[%s3631_s11 + $0x48] sm:$0xff]  ;;  %v3014_v39 = vpack.c.bf16 %v367_v33, %v366_v32  ;;  %v368_v40 = vld [vmem:[%s3631_s11 + $0xd0] sm:$0xff] }
  0x82   : > { %v369_v41 = vld [vmem:[%s3631_s11 + $0xd8] sm:$0xff]  ;;  %v3016_v42 = vpack.c.bf16 %v351_v36, %v350_v35  ;;  %v391_v44 = vld [vmem:[#allocation2 + $0x88] sm:$0xff]  ;;  %v352_v45 = vld [vmem:[%s3631_s11 + $0x50] sm:$0xff] }
  0x83   : > { %3005 = vmatpush3.bf16.msra.mxu0 %v3004_v17  ;;  %3199 = vmatpush3.bf16.msra.mxu1 %v3004_v17  ;;  %v353_v46 = vld [vmem:[%s3631_s11 + $0x58] sm:$0xff]  ;;  %v3018_v49 = vpack.c.bf16 %v369_v41, %v368_v40  ;;  %v370_v50 = vld [vmem:[%s3631_s11 + $0xe0] sm:$0xff]  ;;  %v371_v51 = vld [vmem:[%s3631_s11 + $0xe8] sm:$0xff] }
  0x84   : > { %3007 = vmatprep.subr.bf16.mxu0 %v3006_v23  ;;  %3192 = vmatprep.subr.bf16.mxu1 %v3006_v23  ;;  %v3020_v52 = vpack.c.bf16 %v353_v46, %v352_v45  ;;  %v354_v53 = vld [vmem:[%s3631_s11 + $0x60] sm:$0xff]  ;;  %v355_v54 = vld [vmem:[%s3631_s11 + $0x68] sm:$0xff]  ;;  %v3022_v57 = vpack.c.bf16 %v371_v51, %v370_v50  ;;  %v372_v58 = vld [vmem:[%s3631_s11 + $0xf0] sm:$0xff] }
  0x85   : > { %459 = vperm.xlu1 %3277, %v413_v29   ;;  %454 = vperm.xlu0 %3276, %v412_v30   ;;  %v419_v55 = vld [vmem:[#allocation6 + $0x68] sm:$0xff]  ;;  %v373_v59 = vld [vmem:[%s3631_s11 + $0xf8] sm:$0xff]  ;;  %v3024_v60 = vpack.c.bf16 %v355_v54, %v354_v53  ;;  %v356_v61 = vld [vmem:[%s3631_s11 + $0x70] sm:$0xff] }
  0x86   : > { %606 = vmatprep.mubr.f32.mxu1 %v391_v44  ;;  %v357_v62 = vld [vmem:[%s3631_s11 + $0x78] sm:$0xff]  ;;  %v420_v0 = vld [vmem:[#allocation6 + $0x70] sm:$0xff]  ;;  %v3026_v1 = vpack.c.bf16 %v373_v59, %v372_v58  ;;  %v681_v3 = vld [vmem:[#allocation6 + $0x88] sm:$0xff] }
  0x87   : > { %3009 = vmatpush3.bf16.msra.mxu0 %v3008_v26  ;;  %3200 = vmatpush3.bf16.msra.mxu1 %v3008_v26  ;;  %v421_v63 = vld [vmem:[#allocation6 + $0x78] sm:$0xff]  ;;  %v3028_v2 = vpack.c.bf16 %v357_v62, %v356_v61  ;;  %v680_v4 = vld [vmem:[#allocation6 + $0x80] sm:$0xff]  ;;  %v682_v10 = vld [vmem:[#allocation6 + $0x90] sm:$0xff] }
  0x88   : > { %3011 = vmatprep.subr.bf16.mxu0 %v3010_v31  ;;  %3193 = vmatprep.subr.bf16.mxu1 %v3010_v31  ;;  %v374_v5 = vld [vmem:[#allocation2] sm:$0xff]  ;;  %v377_v7 = vld [vmem:[#allocation2 + $0x18] sm:$0xff]  ;;  %v376_v11 = vld [vmem:[#allocation2 + $0x10] sm:$0xff] }
  0x89   : > { %469 = vperm.xlu1 %3277, %v415_v37   ;;  %464 = vperm.xlu0 %3276, %v414_v38   ;;  %v390_v6 = vld [vmem:[#allocation2 + $0x80] sm:$0xff]  ;;  %v393_v8 = vld [vmem:[#allocation2 + $0x98] sm:$0xff]  ;;  %v392_v12 = vld [vmem:[#allocation2 + $0x90] sm:$0xff] }
  0x8a   : > { %v683_v9 = vld [vmem:[#allocation6 + $0x98] sm:$0xff]  ;;  %v379_v13 = vld [vmem:[#allocation2 + $0x28] sm:$0xff]  ;;  %v684_v16 = vld [vmem:[#allocation6 + $0xa0] sm:$0xff] }
  0x8b   : > { %3013 = vmatpush3.bf16.msra.mxu0 %v3012_v34  ;;  %3201 = vmatpush3.bf16.msra.mxu1 %v3012_v34  ;;  %v395_v14 = vld [vmem:[#allocation2 + $0xa8] sm:$0xff]  ;;  %v378_v17 = vld [vmem:[#allocation2 + $0x20] sm:$0xff]  ;;  %v381_v19 = vld [vmem:[#allocation2 + $0x38] sm:$0xff] }
  0x8c   : > { %3015 = vmatprep.subr.bf16.mxu0 %v3014_v39  ;;  %3194 = vmatprep.subr.bf16.mxu1 %v3014_v39  ;;  %v685_v15 = vld [vmem:[#allocation6 + $0xa8] sm:$0xff]  ;;  %v394_v18 = vld [vmem:[#allocation2 + $0xa0] sm:$0xff]  ;;  %v397_v20 = vld [vmem:[#allocation2 + $0xb8] sm:$0xff] }
  0x8d   : > { %479 = vperm.xlu1 %3277, %v417_v47   ;;  %474 = vperm.xlu0 %3276, %v416_v48   ;;  %v687_v21 = vld [vmem:[#allocation6 + $0xb8] sm:$0xff]  ;;  %v686_v22 = vld [vmem:[#allocation6 + $0xb0] sm:$0xff]  ;;  %v383_v25 = vld [vmem:[#allocation2 + $0x48] sm:$0xff] }
  0x8e   : > { %v380_v23 = vld [vmem:[#allocation2 + $0x30] sm:$0xff]  ;;  %v399_v26 = vld [vmem:[#allocation2 + $0xc8] sm:$0xff]  ;;  %v688_v28 = vld [vmem:[#allocation6 + $0xc0] sm:$0xff] }
  0x8f   : > { %3017 = vmatpush3.bf16.msra.mxu0 %v3016_v42  ;;  %3202 = vmatpush3.bf16.msra.mxu1 %v3016_v42  ;;  %v396_v24 = vld [vmem:[#allocation2 + $0xb0] sm:$0xff]  ;;  %v689_v27 = vld [vmem:[#allocation6 + $0xc8] sm:$0xff]  ;;  %v382_v29 = vld [vmem:[#allocation2 + $0x40] sm:$0xff] }
  0x90   : > { %3019 = vmatprep.subr.bf16.mxu0 %v3018_v49  ;;  %3195 = vmatprep.subr.bf16.mxu1 %v3018_v49  ;;  %v398_v30 = vld [vmem:[#allocation2 + $0xc0] sm:$0xff]  ;;  %v385_v31 = vld [vmem:[#allocation2 + $0x58] sm:$0xff]  ;;  %v690_v34 = vld [vmem:[#allocation6 + $0xd0] sm:$0xff] }
  0x91   : > { %489 = vperm.xlu1 %3277, %v419_v55   ;;  %484 = vperm.xlu0 %3276, %v418_v56   ;;  %v401_v32 = vld [vmem:[#allocation2 + $0xd8] sm:$0xff]  ;;  %v384_v35 = vld [vmem:[#allocation2 + $0x50] sm:$0xff]  ;;  %v387_v37 = vld [vmem:[#allocation2 + $0x68] sm:$0xff] }
  0x92   : > { %v691_v33 = vld [vmem:[#allocation6 + $0xd8] sm:$0xff]  ;;  %v400_v36 = vld [vmem:[#allocation2 + $0xd0] sm:$0xff]  ;;  %v403_v38 = vld [vmem:[#allocation2 + $0xe8] sm:$0xff] }
  0x93   : > { %3021 = vmatpush3.bf16.msra.mxu0 %v3020_v52  ;;  %3203 = vmatpush3.bf16.msra.mxu1 %v3020_v52  ;;  %v693_v39 = vld [vmem:[#allocation6 + $0xe8] sm:$0xff]  ;;  %v692_v40 = vld [vmem:[#allocation6 + $0xe0] sm:$0xff]  ;;  %v389_v43 = vld [vmem:[#allocation2 + $0x78] sm:$0xff] }
  0x94   : > { %3023 = vmatprep.subr.bf16.mxu0 %v3022_v57  ;;  %3196 = vmatprep.subr.bf16.mxu1 %v3022_v57  ;;  %v386_v41 = vld [vmem:[#allocation2 + $0x60] sm:$0xff]  ;;  %v405_v44 = vld [vmem:[#allocation2 + $0xf8] sm:$0xff]  ;;  %v694_v46 = vld [vmem:[#allocation6 + $0xf0] sm:$0xff] }
  0x95   : > { %499 = vperm.xlu1 %3277, %v421_v63   ;;  %494 = vperm.xlu0 %3276, %v420_v0   ;;  %v402_v42 = vld [vmem:[#allocation2 + $0xe0] sm:$0xff]  ;;  %v695_v45 = vld [vmem:[#allocation6 + $0xf8] sm:$0xff]  ;;  %v388_v47 = vld [vmem:[#allocation2 + $0x70] sm:$0xff] }
  0x96   : > { %v404_v48 = vld [vmem:[#allocation2 + $0xf0] sm:$0xff]  ;;  %v956_v49 = vld [vmem:[#allocation6 + $0x108] sm:$0xff]  ;;  %v955_v50 = vld [vmem:[#allocation6 + $0x100] sm:$0xff] }
  0x97   : > { %3025 = vmatpush3.bf16.msra.mxu0 %v3024_v60  ;;  %3204 = vmatpush3.bf16.msra.mxu1 %v3024_v60  ;;  %v958_v51 = vld [vmem:[#allocation6 + $0x118] sm:$0xff]  ;;  %v957_v52 = vld [vmem:[#allocation6 + $0x110] sm:$0xff]  ;;  %v960_v53 = vld [vmem:[#allocation6 + $0x128] sm:$0xff] }
  0x98   : > { %3027 = vmatprep.subr.bf16.mxu0 %v3026_v1  ;;  %3197 = vmatprep.subr.bf16.mxu1 %v3026_v1  ;;  %v959_v54 = vld [vmem:[#allocation6 + $0x120] sm:$0xff]  ;;  %v962_v55 = vld [vmem:[#allocation6 + $0x138] sm:$0xff]  ;;  %v961_v56 = vld [vmem:[#allocation6 + $0x130] sm:$0xff] }
  0x99   : > { %703 = vperm.xlu1 %3277, %v681_v3   ;;  %698 = vperm.xlu0 %3276, %v680_v4   ;;  %v964_v57 = vld [vmem:[#allocation6 + $0x148] sm:$0xff]  ;;  %v963_v58 = vld [vmem:[#allocation6 + $0x140] sm:$0xff]  ;;  %v966_v59 = vld [vmem:[#allocation6 + $0x158] sm:$0xff] }
  0x9a   : > { %v965_v60 = vld [vmem:[#allocation6 + $0x150] sm:$0xff]  ;;  %v968_v61 = vld [vmem:[#allocation6 + $0x168] sm:$0xff]  ;;  %v967_v62 = vld [vmem:[#allocation6 + $0x160] sm:$0xff] }
  0x9b   : > { %3029 = vmatpush3.bf16.msra.mxu0 %v3028_v2  ;;  %3205 = vmatpush3.bf16.msra.mxu1 %v3028_v2  ;;  %v970_v63 = vld [vmem:[#allocation6 + $0x178] sm:$0xff]  ;;  %v969_v0 = vld [vmem:[#allocation6 + $0x170] sm:$0xff]  ;;  %v1231_v1 = vld [vmem:[#allocation6 + $0x188] sm:$0xff] }
  0x9c   : > { %v1230_v2 = vld [vmem:[#allocation6 + $0x180] sm:$0xff]  ;;  %v1233_v3 = vld [vmem:[#allocation6 + $0x198] sm:$0xff]  ;;  %v1232_v4 = vld [vmem:[#allocation6 + $0x190] sm:$0xff] }
  0x9d   : > { %713 = vperm.xlu1 %3277, %v683_v9   ;;  %708 = vperm.xlu0 %3276, %v682_v10   ;;  %v1239_v9 = vld [vmem:[#allocation6 + $0x1c8] sm:$0xff]  ;;  %v1238_v10 = vld [vmem:[#allocation6 + $0x1c0] sm:$0xff] }
  0x9e   : > { %567 = vmatmul.mubr.f32.vlgmr.msra.gmra.mrb[0].mxu0 %v374_v5  ;;  %607 = vmatmul.mubr.f32.vlgmr.msra.gmra.mrb[0].mxu1 %v390_v6  ;;  %v1235_v5 = vld [vmem:[#allocation6 + $0x1a8] sm:$0xff]  ;;  %v1234_v6 = vld [vmem:[#allocation6 + $0x1a0] sm:$0xff] }
  0x9f   : > { %571 = vmatprep.mubr.f32.mxu0 %v377_v7  ;;  %611 = vmatprep.mubr.f32.mxu1 %v393_v8  ;;  %v1237_v7 = vld [vmem:[#allocation6 + $0x1b8] sm:$0xff]  ;;  %v1236_v8 = vld [vmem:[#allocation6 + $0x1b0] sm:$0xff] }
  0xa1   : > { %723 = vperm.xlu1 %3277, %v685_v15   ;;  %718 = vperm.xlu0 %3276, %v684_v16   ;;  %v1245_v15 = vld [vmem:[#allocation6 + $0x1f8] sm:$0xff]  ;;  %v1244_v16 = vld [vmem:[#allocation6 + $0x1f0] sm:$0xff] }
  0xa2   : > { %572 = vmatmul.mubr.f32.gmra.mrb[2].mxu0 %v376_v11  ;;  %612 = vmatmul.mubr.f32.gmra.mrb[2].mxu1 %v392_v12  ;;  %v1241_v11 = vld [vmem:[#allocation6 + $0x1d8] sm:$0xff]  ;;  %v1240_v12 = vld [vmem:[#allocation6 + $0x1d0] sm:$0xff] }
  0xa3   : > { %576 = vmatprep.mubr.f32.mxu0 %v379_v13  ;;  %616 = vmatprep.mubr.f32.mxu1 %v395_v14  ;;  %v1243_v13 = vld [vmem:[#allocation6 + $0x1e8] sm:$0xff]  ;;  %v1242_v14 = vld [vmem:[#allocation6 + $0x1e0] sm:$0xff] }
  0xa5   : > { %733 = vperm.xlu1 %3277, %v687_v21   ;;  %728 = vperm.xlu0 %3276, %v686_v22   ;;  %v1510_v21 = vld [vmem:[#allocation6 + $0x228] sm:$0xff]  ;;  %v1509_v22 = vld [vmem:[#allocation6 + $0x220] sm:$0xff] }
  0xa6   : > { %577 = vmatmul.mubr.f32.gmra.mrb[4].mxu0 %v378_v17  ;;  %617 = vmatmul.mubr.f32.gmra.mrb[4].mxu1 %v394_v18  ;;  %v1506_v17 = vld [vmem:[#allocation6 + $0x208] sm:$0xff]  ;;  %v1505_v18 = vld [vmem:[#allocation6 + $0x200] sm:$0xff] }
  0xa7   : > { %581 = vmatprep.mubr.f32.mxu0 %v381_v19  ;;  %621 = vmatprep.mubr.f32.mxu1 %v397_v20  ;;  %v1508_v19 = vld [vmem:[#allocation6 + $0x218] sm:$0xff]  ;;  %v1507_v20 = vld [vmem:[#allocation6 + $0x210] sm:$0xff] }
  0xa9   : > { %743 = vperm.xlu1 %3277, %v689_v27   ;;  %738 = vperm.xlu0 %3276, %v688_v28   ;;  %v1516_v27 = vld [vmem:[#allocation6 + $0x258] sm:$0xff]  ;;  %v1515_v28 = vld [vmem:[#allocation6 + $0x250] sm:$0xff] }
  0xaa   : > { %582 = vmatmul.mubr.f32.gmra.mrb[6].mxu0 %v380_v23  ;;  %622 = vmatmul.mubr.f32.gmra.mrb[6].mxu1 %v396_v24  ;;  %v1512_v23 = vld [vmem:[#allocation6 + $0x238] sm:$0xff]  ;;  %v1511_v24 = vld [vmem:[#allocation6 + $0x230] sm:$0xff] }
  0xab   : > { %586 = vmatprep.mubr.f32.mxu0 %v383_v25  ;;  %626 = vmatprep.mubr.f32.mxu1 %v399_v26  ;;  %v1514_v25 = vld [vmem:[#allocation6 + $0x248] sm:$0xff]  ;;  %v1513_v26 = vld [vmem:[#allocation6 + $0x240] sm:$0xff] }
  0xad   : > { %753 = vperm.xlu1 %3277, %v691_v33   ;;  %748 = vperm.xlu0 %3276, %v690_v34   ;;  %v1795_v33 = vld [vmem:[#allocation7 + $0x8] sm:$0xff]  ;;  %v1794_v34 = vld [vmem:[#allocation7] sm:$0xff] }
  0xae   : > { %587 = vmatmul.mubr.f32.gmra.mrb[8].mxu0 %v382_v29  ;;  %627 = vmatmul.mubr.f32.gmra.mrb[8].mxu1 %v398_v30  ;;  %v1518_v29 = vld [vmem:[#allocation6 + $0x268] sm:$0xff]  ;;  %v1517_v30 = vld [vmem:[#allocation6 + $0x260] sm:$0xff] }
  0xaf   : > { %591 = vmatprep.mubr.f32.mxu0 %v385_v31  ;;  %631 = vmatprep.mubr.f32.mxu1 %v401_v32  ;;  %v1520_v31 = vld [vmem:[#allocation6 + $0x278] sm:$0xff]  ;;  %v1519_v32 = vld [vmem:[#allocation6 + $0x270] sm:$0xff] }
  0xb1   : > { %763 = vperm.xlu1 %3277, %v693_v39   ;;  %758 = vperm.xlu0 %3276, %v692_v40   ;;  %v1801_v39 = vld [vmem:[#allocation7 + $0x38] sm:$0xff]  ;;  %v1800_v40 = vld [vmem:[#allocation7 + $0x30] sm:$0xff] }
  0xb2   : > { %592 = vmatmul.mubr.f32.gmra.mrb[10].mxu0 %v384_v35  ;;  %632 = vmatmul.mubr.f32.gmra.mrb[10].mxu1 %v400_v36  ;;  %v1797_v35 = vld [vmem:[#allocation7 + $0x18] sm:$0xff]  ;;  %v1796_v36 = vld [vmem:[#allocation7 + $0x10] sm:$0xff] }
  0xb3   : > { %596 = vmatprep.mubr.f32.mxu0 %v387_v37  ;;  %636 = vmatprep.mubr.f32.mxu1 %v403_v38  ;;  %v1799_v37 = vld [vmem:[#allocation7 + $0x28] sm:$0xff]  ;;  %v1798_v38 = vld [vmem:[#allocation7 + $0x20] sm:$0xff] }
  0xb5   : > { %773 = vperm.xlu1 %3277, %v695_v45   ;;  %768 = vperm.xlu0 %3276, %v694_v46   ;;  %v1804_v45 = vld [vmem:[#allocation7 + $0x50] sm:$0xff]  ;;  %v1807_v46 = vld [vmem:[#allocation7 + $0x68] sm:$0xff] }
  0xb6   : > { %597 = vmatmul.mubr.f32.gmra.mrb[12].mxu0 %v386_v41  ;;  %637 = vmatmul.mubr.f32.gmra.mrb[12].mxu1 %v402_v42  ;;  %v663_v41 = vld [vmem:[%s3964_s2] sm:$0xff]  ;;  %v1803_v42 = vld [vmem:[#allocation7 + $0x48] sm:$0xff] }
  0xb7   : > { %601 = vmatprep.mubr.f32.mxu0 %v389_v43  ;;  %641 = vmatprep.mubr.f32.mxu1 %v405_v44  ;;  %v1802_v43 = vld [vmem:[#allocation7 + $0x40] sm:$0xff]  ;;  %v1805_v44 = vld [vmem:[#allocation7 + $0x58] sm:$0xff] }
  0xb9   : > { %978 = vperm.xlu1 %3277, %v956_v49   ;;  %973 = vperm.xlu0 %3276, %v955_v50   ;;  %v1809_v50 = vld [vmem:[#allocation7 + $0x78] sm:$0xff] }
  0xba   : > { %602 = vmatmul.mubr.f32.gmra.mrb[14].mxu0 %v388_v47  ;;  %642 = vmatmul.mubr.f32.gmra.mrb[14].mxu1 %v404_v48  ;;  %v1806_v47 = vld [vmem:[#allocation7 + $0x60] sm:$0xff] }
  0xbb   : > { %2726 = vmatprep.mubr.f32.mxu1 %v663_v41 }
  0xbd   : > { %988 = vperm.xlu1 %3277, %v958_v51   ;;  %983 = vperm.xlu0 %3276, %v957_v52   ;;  %v1808_v51 = vld [vmem:[#allocation7 + $0x70] sm:$0xff]  ;;  %v1811_v52 = vld [vmem:[#allocation7 + $0x88] sm:$0xff] }
  0xc1   : > { %998 = vperm.xlu1 %3277, %v960_v53   ;;  %993 = vperm.xlu0 %3276, %v959_v54   ;;  %v1810_v53 = vld [vmem:[#allocation7 + $0x80] sm:$0xff] }
  0xc5   : > { %1008 = vperm.xlu1 %3277, %v962_v55   ;;  %1003 = vperm.xlu0 %3276, %v961_v56   ;;  %v1813_v56 = vld [vmem:[#allocation7 + $0x98] sm:$0xff] }
  0xc9   : > { %1018 = vperm.xlu1 %3277, %v964_v57   ;;  %1013 = vperm.xlu0 %3276, %v963_v58   ;;  %v1812_v57 = vld [vmem:[#allocation7 + $0x90] sm:$0xff] }
  0xcd   : > { %1028 = vperm.xlu1 %3277, %v966_v59   ;;  %1023 = vperm.xlu0 %3276, %v965_v60   ;;  %v1815_v60 = vld [vmem:[#allocation7 + $0xa8] sm:$0xff] }
  0xd1   : > { %1038 = vperm.xlu1 %3277, %v968_v61   ;;  %1033 = vperm.xlu0 %3276, %v967_v62   ;;  %v1814_v61 = vld [vmem:[#allocation7 + $0xa0] sm:$0xff]  ;;  %v1817_v62 = vld [vmem:[#allocation7 + $0xb8] sm:$0xff] }
  0xd5   : > { %1048 = vperm.xlu1 %3277, %v970_v63   ;;  %1043 = vperm.xlu0 %3276, %v969_v0   ;;  %v1816_v63 = vld [vmem:[#allocation7 + $0xb0] sm:$0xff] }
  0xd9   : > { %1253 = vperm.xlu1 %3277, %v1231_v1   ;;  %1248 = vperm.xlu0 %3276, %v1230_v2   ;;  %v1819_v2 = vld [vmem:[#allocation7 + $0xc8] sm:$0xff] }
  0xdd   : > { %1263 = vperm.xlu1 %3277, %v1233_v3   ;;  %1258 = vperm.xlu0 %3276, %v1232_v4   ;;  %v1818_v3 = vld [vmem:[#allocation7 + $0xc0] sm:$0xff] }
  0xe1   : > { %1273 = vperm.xlu1 %3277, %v1235_v5   ;;  %1268 = vperm.xlu0 %3276, %v1234_v6   ;;  %v1821_v6 = vld [vmem:[#allocation7 + $0xd8] sm:$0xff] }
  0xe5   : > { %1283 = vperm.xlu1 %3277, %v1237_v7   ;;  %1278 = vperm.xlu0 %3276, %v1236_v8   ;;  %v1820_v7 = vld [vmem:[#allocation7 + $0xd0] sm:$0xff]  ;;  %v1823_v8 = vld [vmem:[#allocation7 + $0xe8] sm:$0xff] }
  0xe9   : > { %1293 = vperm.xlu1 %3277, %v1239_v9   ;;  %1288 = vperm.xlu0 %3276, %v1238_v10   ;;  %v1822_v9 = vld [vmem:[#allocation7 + $0xe0] sm:$0xff] }
  0xed   : > { %1303 = vperm.xlu1 %3277, %v1241_v11   ;;  %1298 = vperm.xlu0 %3276, %v1240_v12   ;;  %v1825_v12 = vld [vmem:[#allocation7 + $0xf8] sm:$0xff] }
  0xf1   : > { %1313 = vperm.xlu1 %3277, %v1243_v13   ;;  %1308 = vperm.xlu0 %3276, %v1242_v14   ;;  %v1824_v13 = vld [vmem:[#allocation7 + $0xf0] sm:$0xff] }
  0xf5   : > { %1323 = vperm.xlu1 %3277, %v1245_v15   ;;  %1318 = vperm.xlu0 %3276, %v1244_v16  }
  0xf7   : > { %v3668_v48 = vpop.permute.xlu1 %434  ;;  %v425_v49 = vpop.permute.xlu0 %424 }
  0xf9   : > { %1528 = vperm.xlu1 %3277, %v1506_v17   ;;  %1523 = vperm.xlu0 %3276, %v1505_v18  }
  0xfb   : > { %v3670_v54 = vpop.permute.xlu1 %439  ;;  %v430_v55 = vpop.permute.xlu0 %429 }
  0xfd   : > { %1538 = vperm.xlu1 %3277, %v1508_v19   ;;  %1533 = vperm.xlu0 %3276, %v1507_v20  }
 0x100   : > { %v3672_v58 = vpop.permute.xlu1 %449  ;;  %v3674_v59 = vpop.permute.xlu0 %444 }
 0x101   : > { %1548 = vperm.xlu1 %3277, %v1510_v21   ;;  %1543 = vperm.xlu0 %3276, %v1509_v22  }
 0x104   : > { %v3676_v0 = vpop.permute.xlu1 %459  ;;  %v3678_v1 = vpop.permute.xlu0 %454 }
 0x105   : > { %1558 = vperm.xlu1 %3277, %v1512_v23   ;;  %1553 = vperm.xlu0 %3276, %v1511_v24  }
 0x108   : > { %v470_v4 = vpop.permute.xlu1 %469  ;;  %v465_v5 = vpop.permute.xlu0 %464 }
 0x109   : > { %1568 = vperm.xlu1 %3277, %v1514_v25   ;;  %1563 = vperm.xlu0 %3276, %v1513_v26  }
 0x10c   : > { %v480_v10 = vpop.permute.xlu1 %479  ;;  %v475_v11 = vpop.permute.xlu0 %474 }
 0x10d   : > { %1578 = vperm.xlu1 %3277, %v1516_v27   ;;  %1573 = vperm.xlu0 %3276, %v1515_v28  }
 0x110   : > { %v3680_v14 = vpop.permute.xlu1 %489  ;;  %v485_v15 = vpop.permute.xlu0 %484 }
 0x111   : > { %1588 = vperm.xlu1 %3277, %v1518_v29   ;;  %1583 = vperm.xlu0 %3276, %v1517_v30  }
 0x115   : > { %1598 = vperm.xlu1 %3277, %v1520_v31   ;;  %1593 = vperm.xlu0 %3276, %v1519_v32  }
 0x119   : > { %1833 = vperm.xlu1 %3277, %v1795_v33   ;;  %1828 = vperm.xlu0 %3276, %v1794_v34  }
 0x11d   : > { %1843 = vperm.xlu1 %3277, %v1797_v35   ;;  %1838 = vperm.xlu0 %3276, %v1796_v36  }
 0x121   : > { %1853 = vperm.xlu1 %3277, %v1799_v37   ;;  %1848 = vperm.xlu0 %3276, %v1798_v38  }
 0x125   : > { %1863 = vperm.xlu1 %3277, %v1801_v39   ;;  %1858 = vperm.xlu0 %3276, %v1800_v40  }
 0x129   : > { %1873 = vperm.xlu1 %3277, %v1803_v42   ;;  %1868 = vperm.xlu0 %3276, %v1802_v43  }
 0x12d   : > { %1883 = vperm.xlu1 %3277, %v1805_v44   ;;  %1878 = vperm.xlu0 %3276, %v1804_v45  }
 0x131   : > { %1893 = vperm.xlu1 %3277, %v1807_v46   ;;  %1888 = vperm.xlu0 %3276, %v1806_v47  }
 0x135   : > { %1903 = vperm.xlu1 %3277, %v1809_v50   ;;  %1898 = vperm.xlu0 %3276, %v1808_v51  }
 0x139   : > { %1913 = vperm.xlu1 %3277, %v1811_v52   ;;  %1908 = vperm.xlu0 %3276, %v1810_v53  }
 0x13d   : > { %1923 = vperm.xlu1 %3277, %v1813_v56   ;;  %1918 = vperm.xlu0 %3276, %v1812_v57  }
 0x141   : > { %1933 = vperm.xlu1 %3277, %v1815_v60   ;;  %1928 = vperm.xlu0 %3276, %v1814_v61  }
 0x145   : > { %1943 = vperm.xlu1 %3277, %v1817_v62   ;;  %1938 = vperm.xlu0 %3276, %v1816_v63  }
 0x149   : > { %1953 = vperm.xlu1 %3277, %v1819_v2   ;;  %1948 = vperm.xlu0 %3276, %v1818_v3  }
 0x14d   : > { %1963 = vperm.xlu1 %3277, %v1821_v6   ;;  %1958 = vperm.xlu0 %3276, %v1820_v7  }
 0x151   : > { %1973 = vperm.xlu1 %3277, %v1823_v8   ;;  %1968 = vperm.xlu0 %3276, %v1822_v9  }
 0x155   : > { %1983 = vperm.xlu1 %3277, %v1825_v12   ;;  %1978 = vperm.xlu0 %3276, %v1824_v13  }
 0x171   : > { %v2470_v16 = vpop.f32.mrb[0].mxu0  ;;  %v2494_v17 = vpop.f32.mrb[0].mxu1 }
 0x172   : > { %v2471_v18 = vpop.f32.mrb[1].mxu0  ;;  %v2495_v19 = vpop.f32.mrb[1].mxu1 }
 0x173   : > { %v2472_v20 = vadd.f32 %v2471_v18, %v2470_v16  ;;  %v2496_v21 = vadd.f32 %v2495_v19, %v2494_v17 }
 0x175   : > { %v2473_v22 = vpop.f32.mrb[2].mxu0  ;;  %v609_v23 = vadd.f32 %v2496_v21, %v465_v5  ;;  %v2497_v24 = vpop.f32.mrb[2].mxu1  ;;  %v569_v25 = vadd.f32 %v2472_v20, %v425_v49 }
 0x176   : > { %v2474_v26 = vpop.f32.mrb[3].mxu0  ;;  %v2498_v27 = vpop.f32.mrb[3].mxu1 }
 0x177   : > { %v2475_v28 = vadd.f32 %v2474_v26, %v2473_v22  ;;  %v2499_v29 = vadd.f32 %v2498_v27, %v2497_v24  ;;  %v655_v31 = vmax.f32 %v609_v23, 0.0  ;;  %v647_v35 = vmax.f32 %v569_v25, 0.0  ;;  %v495_v26 = vpop.permute.xlu0 %494 }
 0x179   : > { %v574_v30 = vadd.f32 %v2475_v28, %v430_v55  ;;  %v2476_v32 = vpop.f32.mrb[4].mxu0  ;;  %v614_v33 = vadd.f32 %v2499_v29, %v470_v4  ;;  %v2500_v34 = vpop.f32.mrb[4].mxu1 }
 0x17a   : > { %v2477_v36 = vpop.f32.mrb[5].mxu0  ;;  %v2501_v37 = vpop.f32.mrb[5].mxu1 }
 0x17b   : > { %v648_v38 = vmax.f32 %v574_v30, 0.0  ;;  %v2478_v39 = vadd.f32 %v2477_v36, %v2476_v32  ;;  %v656_v40 = vmax.f32 %v614_v33, 0.0  ;;  %v2502_v41 = vadd.f32 %v2501_v37, %v2500_v34 }
 0x17d   : > { %v619_v42 = vadd.f32 %v2502_v41, %v475_v11  ;;  %v2479_v43 = vpop.f32.mrb[6].mxu0  ;;  %v2503_v44 = vpop.f32.mrb[6].mxu1  ;;  %v3030_v45 = vpack.c.bf16 %v648_v38, %v647_v35  ;;  %v3682_v46 = vpack.c.bf16 %v656_v40, %v655_v31  ;;  %v579_v47 = vadd.f32 %v2478_v39, %v3668_v48 }
 0x17e   : > { %v2480_v49 = vpop.f32.mrb[7].mxu0  ;;  %v2504_v50 = vpop.f32.mrb[7].mxu1 }
 0x17f   : > { %v2481_v51 = vadd.f32 %v2480_v49, %v2479_v43  ;;  %v2505_v52 = vadd.f32 %v2504_v50, %v2503_v44  ;;  %3031 = vmatprep.subr.bf16.mxu1 %v3030_v45  ;;  %v657_v53 = vmax.f32 %v619_v42, 0.0  ;;  %v649_v61 = vmax.f32 %v579_v47, 0.0  ;;  %v500_v35 = vpop.permute.xlu1 %499  ;;  %v666_v44 = vld [vmem:[%s3964_s2 + $0x18] sm:$0xff]  ;;  %v669_v47 = vld [vmem:[%s3964_s2 + $0x30] sm:$0xff]  ;;  %v671_v50 = vld [vmem:[%s3964_s2 + $0x40] sm:$0xff] }
 0x180   : > { %3033 = vmatpush3.bf16.msra.mxu1 %v3030_v45  ;;  %v667_v45 = vld [vmem:[%s3964_s2 + $0x20] sm:$0xff]  ;;  %v670_v49 = vld [vmem:[%s3964_s2 + $0x38] sm:$0xff] }
 0x181   : > { %v584_v55 = vadd.f32 %v2481_v51, %v3670_v54  ;;  %v624_v56 = vadd.f32 %v2505_v52, %v480_v10  ;;  %v2482_v57 = vpop.f32.mrb[8].mxu0  ;;  %v2506_v60 = vpop.f32.mrb[8].mxu1  ;;  %v672_v51 = vld [vmem:[%s3964_s2 + $0x48] sm:$0xff]  ;;  %v673_v52 = vld [vmem:[%s3964_s2 + $0x50] sm:$0xff] }
 0x182   : > { %v2483_v62 = vpop.f32.mrb[9].mxu0  ;;  %v2507_v63 = vpop.f32.mrb[9].mxu1 }
 0x183   : > { %v650_v2 = vmax.f32 %v584_v55, 0.0  ;;  %v658_v3 = vmax.f32 %v624_v56, 0.0  ;;  %v2484_v4 = vadd.f32 %v2483_v62, %v2482_v57  ;;  %v2508_v5 = vadd.f32 %v2507_v63, %v2506_v60  ;;  %v675_v55 = vld [vmem:[%s3964_s2 + $0x60] sm:$0xff]  ;;  %v676_v56 = vld [vmem:[%s3964_s2 + $0x68] sm:$0xff]  ;;  %v677_v57 = vld [vmem:[%s3964_s2 + $0x70] sm:$0xff]  ;;  %v704_v62 = vpop.permute.xlu1 %703  ;;  %v699_v63 = vpop.permute.xlu0 %698 }
 0x184   : > { %v678_v60 = vld [vmem:[%s3964_s2 + $0x78] sm:$0xff] }
 0x185   : > { %v2485_v48 = vpop.f32.mrb[10].mxu0  ;;  %v2509_v6 = vpop.f32.mrb[10].mxu1  ;;  %v3034_v7 = vpack.c.bf16 %v650_v2, %v649_v61  ;;  %v3050_v8 = vpack.c.bf16 %v658_v3, %v657_v53  ;;  %v589_v9 = vadd.f32 %v2484_v4, %v3674_v59  ;;  %v629_v11 = vadd.f32 %v2508_v5, %v485_v15  ;;  %v674_v53 = vld [vmem:[%s3964_s2 + $0x58] sm:$0xff]  ;;  %v2386_v61 = vld [vmem:[%s3964_s2 + $0x80] sm:$0xff] }
 0x186   : > { %v2486_v12 = vpop.f32.mrb[11].mxu0  ;;  %v2510_v13 = vpop.f32.mrb[11].mxu1 }
 0x187   : > { %v2487_v54 = vadd.f32 %v2486_v12, %v2485_v48  ;;  %v2511_v10 = vadd.f32 %v2510_v13, %v2509_v6  ;;  %3035 = vmatprep.subr.bf16.mxu1 %v3034_v7  ;;  %v651_v20 = vmax.f32 %v589_v9, 0.0  ;;  %v659_v21 = vmax.f32 %v629_v11, 0.0  ;;  %v714_v2 = vpop.permute.xlu1 %713  ;;  %v709_v3 = vpop.permute.xlu0 %708 }
 0x188   : > { %3037 = vmatpush3.bf16.msra.mxu1 %v3034_v7 }
 0x189   : > { %v594_v16 = vadd.f32 %v2487_v54, %v3672_v58  ;;  %v634_v17 = vadd.f32 %v2511_v10, %v3680_v14  ;;  %v2488_v18 = vpop.f32.mrb[12].mxu0  ;;  %v2512_v19 = vpop.f32.mrb[12].mxu1 }
 0x18a   : > { %v2489_v22 = vpop.f32.mrb[13].mxu0  ;;  %v2513_v23 = vpop.f32.mrb[13].mxu1 }
 0x18b   : > { %v652_v24 = vmax.f32 %v594_v16, 0.0  ;;  %v660_v25 = vmax.f32 %v634_v17, 0.0  ;;  %v2490_v59 = vadd.f32 %v2489_v22, %v2488_v18  ;;  %v2514_v15 = vadd.f32 %v2513_v23, %v2512_v19  ;;  %v724_v4 = vpop.permute.xlu1 %723  ;;  %v719_v5 = vpop.permute.xlu0 %718 }
 0x18d   : > { %v2491_v27 = vpop.f32.mrb[14].mxu0  ;;  %v2515_v28 = vpop.f32.mrb[14].mxu1  ;;  %v3038_v29 = vpack.c.bf16 %v652_v24, %v651_v20  ;;  %v3054_v30 = vpack.c.bf16 %v660_v25, %v659_v21  ;;  %v599_v58 = vadd.f32 %v2490_v59, %v3678_v1  ;;  %v639_v14 = vadd.f32 %v2514_v15, %v495_v26  ;;  %v665_v1 = vld [vmem:[%s3964_s2 + $0x10] sm:$0xff] }
 0x18e   : > { %v2492_v31 = vpop.f32.mrb[15].mxu0  ;;  %v2516_v32 = vpop.f32.mrb[15].mxu1 }
 0x18f   : > { %v2493_v33 = vadd.f32 %v2492_v31, %v2491_v27  ;;  %v2517_v34 = vadd.f32 %v2516_v32, %v2515_v28  ;;  %3039 = vmatprep.subr.bf16.mxu1 %v3038_v29  ;;  %v653_v38 = vmax.f32 %v599_v58, 0.0  ;;  %v661_v39 = vmax.f32 %v639_v14, 0.0  ;;  %v734_v11 = vpop.permute.xlu1 %733  ;;  %v729_v54 = vpop.permute.xlu0 %728 }
 0x190   : > { %3041 = vmatpush3.bf16.msra.mxu1 %v3038_v29 }
 0x191   : > { %v604_v36 = vadd.f32 %v2493_v33, %v3676_v0  ;;  %v644_v37 = vadd.f32 %v2517_v34, %v500_v35  ;;  %v664_v0 = vld [vmem:[%s3964_s2 + $0x8] sm:$0xff] }
 0x193   : > { %v654_v40 = vmax.f32 %v604_v36, 0.0  ;;  %v662_v41 = vmax.f32 %v644_v37, 0.0  ;;  %v744_v24 = vpop.permute.xlu1 %743  ;;  %v739_v15 = vpop.permute.xlu0 %738 }
 0x195   : > { %v3042_v42 = vpack.c.bf16 %v654_v40, %v653_v38  ;;  %v3058_v43 = vpack.c.bf16 %v662_v41, %v661_v39 }
 0x197   : > { %3043 = vmatprep.subr.bf16.mxu1 %v3042_v42  ;;  %v754_v14 = vpop.permute.xlu1 %753  ;;  %v749_v35 = vpop.permute.xlu0 %748 }
 0x198   : > { %3045 = vmatpush3.bf16.msra.mxu1 %v3042_v42 }
 0x199   : > { %3047 = vmatprep.subr.bf16.mxu1 %v3682_v46 }
 0x19c   : > { %3049 = vmatpush3.bf16.msra.mxu1 %v3682_v46  ;;  %v668_v46 = vld [vmem:[%s3964_s2 + $0x28] sm:$0xff] }
 0x19d   : > { %3051 = vmatprep.subr.bf16.mxu1 %v3050_v8 }
 0x1a0   : > { %3053 = vmatpush3.bf16.msra.mxu1 %v3050_v8 }
 0x1a1   : > { %3055 = vmatprep.subr.bf16.mxu1 %v3054_v30 }
 0x1a4   : > { %3057 = vmatpush3.bf16.msra.mxu1 %v3054_v30 }
 0x1a5   : > { %3059 = vmatprep.subr.bf16.mxu1 %v3058_v43 }
 0x1a8   : > { %3061 = vmatpush3.bf16.msra.mxu1 %v3058_v43 }
 0x1ab   : > { %2727 = vmatmul.mubr.f32.vlgmr.msra.gmra.mrb[16].mxu1 %v664_v0 }
 0x1ac   : > { %2729 = vmatprep.mubr.f32.mxu1 %v665_v1  ;;  %v764_v1 = vpop.permute.xlu1 %763 }
 0x1af   : > { %2730 = vmatmul.mubr.f32.gmra.mrb[18].mxu1 %v666_v44 }
 0x1b0   : > { %2732 = vmatprep.mubr.f32.mxu1 %v667_v45 }
 0x1b3   : > { %2733 = vmatmul.mubr.f32.gmra.mrb[20].mxu1 %v668_v46  ;;  %v759_v46 = vpop.permute.xlu0 %758 }
 0x1b4   : > { %2735 = vmatprep.mubr.f32.mxu1 %v669_v47 }
 0x1b7   : > { %2736 = vmatmul.mubr.f32.gmra.mrb[22].mxu1 %v670_v49 }
 0x1b8   : > { %2738 = vmatprep.mubr.f32.mxu1 %v671_v50 }
 0x1bb   : > { %2739 = vmatmul.mubr.f32.gmra.mrb[24].mxu1 %v672_v51 }
 0x1bc   : > { %2741 = vmatprep.mubr.f32.mxu1 %v673_v52 }
 0x1bf   : > { %2742 = vmatmul.mubr.f32.gmra.mrb[26].mxu1 %v674_v53 }
 0x1c0   : > { %2744 = vmatprep.mubr.f32.mxu1 %v675_v55 }
 0x1c3   : > { %2745 = vmatmul.mubr.f32.gmra.mrb[28].mxu1 %v676_v56 }
 0x1c4   : > { %2747 = vmatprep.mubr.f32.mxu1 %v677_v57  ;;  %v774_v57 = vpop.permute.xlu1 %773 }
 0x1c7   : > { %2748 = vmatmul.mubr.f32.gmra.mrb[30].mxu1 %v678_v60 }
 0x1c8   : > { %2782 = vmatprep.mubr.f32.mxu1 %v2386_v61 }
 0x27e   : > { %v2728_v48 = vpop.f32.mrb[16].mxu1 }
 0x27f   : > { %v848_v6 = vadd.f32 %v2728_v48, %v704_v62  ;;  %v842_v7 = vpop.f32.mrb[17].mxu1  ;;  %v769_v62 = vpop.permute.xlu0 %768 }
 0x280   : > { %v843_v8 = vadd.f32 %v842_v7, %v699_v63  ;;  %v2387_v7 = vld [vmem:[%s3964_s2 + $0x88] sm:$0xff] }
 0x281   : > { %v922_v9 = vmax.f32 %v848_v6, 0.0 }
 0x282   : > { %v921_v12 = vmax.f32 %v843_v8, 0.0  ;;  %v2731_v13 = vpop.f32.mrb[18].mxu1  ;;  %v2388_v8 = vld [vmem:[%s3964_s2 + $0x90] sm:$0xff] }
 0x283   : > { %v858_v10 = vadd.f32 %v2731_v13, %v714_v2  ;;  %v852_v16 = vpop.f32.mrb[19].mxu1  ;;  %v2392_v13 = vld [vmem:[%s3964_s2 + $0xb0] sm:$0xff] }
 0x284   : > { %v3062_v17 = vpack.c.bf16 %v922_v9, %v921_v12  ;;  %v853_v18 = vadd.f32 %v852_v16, %v709_v3  ;;  %v2389_v9 = vld [vmem:[%s3964_s2 + $0x98] sm:$0xff]  ;;  %v2391_v12 = vld [vmem:[%s3964_s2 + $0xa8] sm:$0xff] }
 0x285   : > { %v924_v19 = vmax.f32 %v858_v10, 0.0  ;;  %v2394_v10 = vld [vmem:[%s3964_s2 + $0xc0] sm:$0xff]  ;;  %v2395_v16 = vld [vmem:[%s3964_s2 + $0xc8] sm:$0xff] }
 0x286   : > { %v923_v20 = vmax.f32 %v853_v18, 0.0  ;;  %v2734_v21 = vpop.f32.mrb[20].mxu1  ;;  %3063 = vmatprep.subr.bf16.mxu1 %v3062_v17  ;;  %v2397_v18 = vld [vmem:[%s3964_s2 + $0xd8] sm:$0xff] }
 0x287   : > { %v868_v22 = vadd.f32 %v2734_v21, %v724_v4  ;;  %v862_v23 = vpop.f32.mrb[21].mxu1  ;;  %3065 = vmatpush3.bf16.msra.mxu1 %v3062_v17  ;;  %v2396_v17 = vld [vmem:[%s3964_s2 + $0xd0] sm:$0xff] }
 0x288   : > { %v3066_v25 = vpack.c.bf16 %v924_v19, %v923_v20  ;;  %v863_v59 = vadd.f32 %v862_v23, %v719_v5  ;;  %v2398_v19 = vld [vmem:[%s3964_s2 + $0xe0] sm:$0xff]  ;;  %v2399_v20 = vld [vmem:[%s3964_s2 + $0xe8] sm:$0xff]  ;;  %v2400_v21 = vld [vmem:[%s3964_s2 + $0xf0] sm:$0xff] }
 0x289   : > { %v926_v26 = vmax.f32 %v868_v22, 0.0  ;;  %v2401_v22 = vld [vmem:[%s3964_s2 + $0xf8] sm:$0xff]  ;;  %v2402_v23 = vld [vmem:[%s3964_s2 + $0x100] sm:$0xff] }
 0x28a   : > { %v925_v27 = vmax.f32 %v863_v59, 0.0  ;;  %v2737_v28 = vpop.f32.mrb[22].mxu1  ;;  %3067 = vmatprep.subr.bf16.mxu1 %v3066_v25  ;;  %2838 = vmatprep.mubr.f32.mxu0 %v2402_v23 }
 0x28b   : > { %v878_v29 = vadd.f32 %v2737_v28, %v734_v11  ;;  %v872_v30 = vpop.f32.mrb[23].mxu1  ;;  %3069 = vmatpush3.bf16.msra.mxu1 %v3066_v25  ;;  %v2390_v11 = vld [vmem:[%s3964_s2 + $0xa0] sm:$0xff]  ;;  %v974_v25 = vpop.permute.xlu0 %973 }
 0x28c   : > { %v3070_v31 = vpack.c.bf16 %v926_v26, %v925_v27  ;;  %v873_v32 = vadd.f32 %v872_v30, %v729_v54  ;;  %v2393_v54 = vld [vmem:[%s3964_s2 + $0xb8] sm:$0xff] }
 0x28d   : > { %v928_v58 = vmax.f32 %v878_v29, 0.0 }
 0x28e   : > { %v927_v33 = vmax.f32 %v873_v32, 0.0  ;;  %v2740_v34 = vpop.f32.mrb[24].mxu1  ;;  %3071 = vmatprep.subr.bf16.mxu1 %v3070_v31 }
 0x28f   : > { %v888_v36 = vadd.f32 %v2740_v34, %v744_v24  ;;  %v882_v37 = vpop.f32.mrb[25].mxu1  ;;  %3073 = vmatpush3.bf16.msra.mxu1 %v3070_v31  ;;  %v979_v24 = vpop.permute.xlu1 %978 }
 0x290   : > { %v3074_v38 = vpack.c.bf16 %v928_v58, %v927_v33  ;;  %v883_v39 = vadd.f32 %v882_v37, %v739_v15  ;;  %v984_v15 = vpop.permute.xlu0 %983 }
 0x291   : > { %v930_v40 = vmax.f32 %v888_v36, 0.0 }
 0x292   : > { %v929_v41 = vmax.f32 %v883_v39, 0.0  ;;  %v2743_v42 = vpop.f32.mrb[26].mxu1  ;;  %3075 = vmatprep.subr.bf16.mxu1 %v3074_v38 }
 0x293   : > { %v898_v43 = vadd.f32 %v2743_v42, %v754_v14  ;;  %v892_v0 = vpop.f32.mrb[27].mxu1  ;;  %3077 = vmatpush3.bf16.msra.mxu1 %v3074_v38  ;;  %v989_v59 = vpop.permute.xlu1 %988 }
 0x294   : > { %v3078_v44 = vpack.c.bf16 %v930_v40, %v929_v41  ;;  %v893_v45 = vadd.f32 %v892_v0, %v749_v35  ;;  %v994_v27 = vpop.permute.xlu0 %993 }
 0x295   : > { %v932_v47 = vmax.f32 %v898_v43, 0.0 }
 0x296   : > { %v931_v49 = vmax.f32 %v893_v45, 0.0  ;;  %v2746_v50 = vpop.f32.mrb[28].mxu1  ;;  %3079 = vmatprep.subr.bf16.mxu1 %v3078_v44 }
 0x297   : > { %v908_v51 = vadd.f32 %v2746_v50, %v764_v1  ;;  %v902_v52 = vpop.f32.mrb[29].mxu1  ;;  %3081 = vmatpush3.bf16.msra.mxu1 %v3078_v44  ;;  %v999_v26 = vpop.permute.xlu1 %998 }
 0x298   : > { %v3082_v53 = vpack.c.bf16 %v932_v47, %v931_v49  ;;  %v903_v55 = vadd.f32 %v902_v52, %v759_v46  ;;  %v1004_v34 = vpop.permute.xlu0 %1003 }
 0x299   : > { %v934_v56 = vmax.f32 %v908_v51, 0.0 }
 0x29a   : > { %v933_v60 = vmax.f32 %v903_v55, 0.0  ;;  %v2749_v61 = vpop.f32.mrb[30].mxu1  ;;  %3083 = vmatprep.subr.bf16.mxu1 %v3082_v53 }
 0x29b   : > { %v918_v63 = vadd.f32 %v2749_v61, %v774_v57  ;;  %v912_v2 = vpop.f32.mrb[31].mxu1  ;;  %3085 = vmatpush3.bf16.msra.mxu1 %v3082_v53  ;;  %v1009_v58 = vpop.permute.xlu1 %1008 }
 0x29c   : > { %v3086_v3 = vpack.c.bf16 %v934_v56, %v933_v60  ;;  %v913_v4 = vadd.f32 %v912_v2, %v769_v62  ;;  %v1014_v45 = vpop.permute.xlu0 %1013 }
 0x29d   : > { %v936_v5 = vmax.f32 %v918_v63, 0.0 }
 0x29e   : > { %v935_v48 = vmax.f32 %v913_v4, 0.0  ;;  %3087 = vmatprep.subr.bf16.mxu1 %v3086_v3 }
 0x29f   : > { %3089 = vmatpush3.bf16.msra.mxu1 %v3086_v3  ;;  %v1019_v0 = vpop.permute.xlu1 %1018 }
 0x2a0   : > { %v3090_v6 = vpack.c.bf16 %v936_v5, %v935_v48  ;;  %v1024_v61 = vpop.permute.xlu0 %1023 }
 0x2a2   : > { %3091 = vmatprep.subr.bf16.mxu1 %v3090_v6 }
 0x2a3   : > { %3093 = vmatpush3.bf16.msra.mxu1 %v3090_v6  ;;  %v1029_v56 = vpop.permute.xlu1 %1028 }
 0x2a6   : > { %2783 = vmatmul.mubr.f32.vlgmr.msra.gmra.mrb[32].mxu1 %v2387_v7 }
 0x2a7   : > { %2785 = vmatprep.mubr.f32.mxu1 %v2388_v8  ;;  %v1039_v8 = vpop.permute.xlu1 %1038 }
 0x2aa   : > { %2786 = vmatmul.mubr.f32.gmra.mrb[34].mxu1 %v2389_v9 }
 0x2ab   : > { %2788 = vmatprep.mubr.f32.mxu1 %v2390_v11 }
 0x2ae   : > { %2789 = vmatmul.mubr.f32.gmra.mrb[36].mxu1 %v2391_v12  ;;  %v1034_v12 = vpop.permute.xlu0 %1033 }
 0x2af   : > { %2791 = vmatprep.mubr.f32.mxu1 %v2392_v13 }
 0x2b2   : > { %2792 = vmatmul.mubr.f32.gmra.mrb[38].mxu1 %v2393_v54 }
 0x2b3   : > { %2794 = vmatprep.mubr.f32.mxu1 %v2394_v10 }
 0x2b6   : > { %2795 = vmatmul.mubr.f32.gmra.mrb[40].mxu1 %v2395_v16 }
 0x2b7   : > { %2797 = vmatprep.mubr.f32.mxu1 %v2396_v17 }
 0x2ba   : > { %2798 = vmatmul.mubr.f32.gmra.mrb[42].mxu1 %v2397_v18 }
 0x2bb   : > { %2800 = vmatprep.mubr.f32.mxu1 %v2398_v19 }
 0x2be   : > { %2801 = vmatmul.mubr.f32.gmra.mrb[44].mxu1 %v2399_v20 }
 0x2bf   : > { %2803 = vmatprep.mubr.f32.mxu1 %v2400_v21  ;;  %v1049_v21 = vpop.permute.xlu1 %1048 }
 0x2c2   : > { %2804 = vmatmul.mubr.f32.gmra.mrb[46].mxu1 %v2401_v22 }
 0x379   : > { %v2784_v28 = vpop.f32.mrb[32].mxu1 }
 0x37a   : > { %v1123_v29 = vadd.f32 %v2784_v28, %v979_v24  ;;  %v1117_v30 = vpop.f32.mrb[33].mxu1  ;;  %v1044_v24 = vpop.permute.xlu0 %1043 }
 0x37b   : > { %v1118_v31 = vadd.f32 %v1117_v30, %v974_v25  ;;  %v2403_v30 = vld [vmem:[%s3964_s2 + $0x108] sm:$0xff] }
 0x37c   : > { %v1197_v32 = vmax.f32 %v1123_v29, 0.0 }
 0x37d   : > { %v1196_v14 = vmax.f32 %v1118_v31, 0.0  ;;  %v2787_v33 = vpop.f32.mrb[34].mxu1  ;;  %v2404_v31 = vld [vmem:[%s3964_s2 + $0x110] sm:$0xff] }
 0x37e   : > { %v1133_v35 = vadd.f32 %v2787_v33, %v989_v59  ;;  %v1127_v36 = vpop.f32.mrb[35].mxu1  ;;  %v2408_v33 = vld [vmem:[%s3964_s2 + $0x130] sm:$0xff] }
 0x37f   : > { %v3094_v37 = vpack.c.bf16 %v1197_v32, %v1196_v14  ;;  %v1128_v38 = vadd.f32 %v1127_v36, %v984_v15  ;;  %v2405_v32 = vld [vmem:[%s3964_s2 + $0x118] sm:$0xff]  ;;  %v2407_v14 = vld [vmem:[%s3964_s2 + $0x128] sm:$0xff] }
 0x380   : > { %v1199_v39 = vmax.f32 %v1133_v35, 0.0  ;;  %v2410_v35 = vld [vmem:[%s3964_s2 + $0x140] sm:$0xff]  ;;  %v2411_v36 = vld [vmem:[%s3964_s2 + $0x148] sm:$0xff] }
 0x381   : > { %v1198_v40 = vmax.f32 %v1128_v38, 0.0  ;;  %v2790_v41 = vpop.f32.mrb[36].mxu1  ;;  %3095 = vmatprep.subr.bf16.mxu0 %v3094_v37  ;;  %v2413_v38 = vld [vmem:[%s3964_s2 + $0x158] sm:$0xff] }
 0x382   : > { %v1143_v42 = vadd.f32 %v2790_v41, %v999_v26  ;;  %v1137_v43 = vpop.f32.mrb[37].mxu1  ;;  %3097 = vmatpush3.bf16.msra.mxu0 %v3094_v37  ;;  %v2412_v37 = vld [vmem:[%s3964_s2 + $0x150] sm:$0xff] }
 0x383   : > { %v3098_v1 = vpack.c.bf16 %v1199_v39, %v1198_v40  ;;  %v1138_v44 = vadd.f32 %v1137_v43, %v994_v27  ;;  %v2414_v39 = vld [vmem:[%s3964_s2 + $0x160] sm:$0xff]  ;;  %v2415_v40 = vld [vmem:[%s3964_s2 + $0x168] sm:$0xff]  ;;  %v2416_v41 = vld [vmem:[%s3964_s2 + $0x170] sm:$0xff] }
 0x384   : > { %v1201_v46 = vmax.f32 %v1143_v42, 0.0  ;;  %v2417_v42 = vld [vmem:[%s3964_s2 + $0x178] sm:$0xff]  ;;  %v2418_v43 = vld [vmem:[%s3964_s2 + $0x180] sm:$0xff] }
 0x385   : > { %v1200_v47 = vmax.f32 %v1138_v44, 0.0  ;;  %v2793_v49 = vpop.f32.mrb[38].mxu1  ;;  %3099 = vmatprep.subr.bf16.mxu0 %v3098_v1  ;;  %2894 = vmatprep.mubr.f32.mxu1 %v2418_v43 }
 0x386   : > { %v1153_v50 = vadd.f32 %v2793_v49, %v1009_v58  ;;  %v1147_v51 = vpop.f32.mrb[39].mxu1  ;;  %3101 = vmatpush3.bf16.msra.mxu0 %v3098_v1  ;;  %v2406_v58 = vld [vmem:[%s3964_s2 + $0x120] sm:$0xff]  ;;  %v1249_v1 = vpop.permute.xlu0 %1248 }
 0x387   : > { %v3102_v52 = vpack.c.bf16 %v1201_v46, %v1200_v47  ;;  %v1148_v53 = vadd.f32 %v1147_v51, %v1004_v34  ;;  %v2409_v34 = vld [vmem:[%s3964_s2 + $0x138] sm:$0xff] }
 0x388   : > { %v1203_v55 = vmax.f32 %v1153_v50, 0.0 }
 0x389   : > { %v1202_v57 = vmax.f32 %v1148_v53, 0.0  ;;  %v2796_v60 = vpop.f32.mrb[40].mxu1  ;;  %3103 = vmatprep.subr.bf16.mxu0 %v3102_v52 }
 0x38a   : > { %v1163_v62 = vadd.f32 %v2796_v60, %v1019_v0  ;;  %v1157_v63 = vpop.f32.mrb[41].mxu1  ;;  %3105 = vmatpush3.bf16.msra.mxu0 %v3102_v52  ;;  %v1254_v0 = vpop.permute.xlu1 %1253 }
 0x38b   : > { %v3106_v2 = vpack.c.bf16 %v1203_v55, %v1202_v57  ;;  %v1158_v3 = vadd.f32 %v1157_v63, %v1014_v45  ;;  %v1259_v45 = vpop.permute.xlu0 %1258 }
 0x38c   : > { %v1205_v4 = vmax.f32 %v1163_v62, 0.0 }
 0x38d   : > { %v1204_v5 = vmax.f32 %v1158_v3, 0.0  ;;  %v2799_v48 = vpop.f32.mrb[42].mxu1  ;;  %3107 = vmatprep.subr.bf16.mxu0 %v3106_v2 }
 0x38e   : > { %v1173_v6 = vadd.f32 %v2799_v48, %v1029_v56  ;;  %v1167_v7 = vpop.f32.mrb[43].mxu1  ;;  %3109 = vmatpush3.bf16.msra.mxu0 %v3106_v2  ;;  %v1264_v44 = vpop.permute.xlu1 %1263 }
 0x38f   : > { %v3110_v9 = vpack.c.bf16 %v1205_v4, %v1204_v5  ;;  %v1168_v11 = vadd.f32 %v1167_v7, %v1024_v61  ;;  %v1269_v47 = vpop.permute.xlu0 %1268 }
 0x390   : > { %v1207_v13 = vmax.f32 %v1173_v6, 0.0 }
 0x391   : > { %v1206_v54 = vmax.f32 %v1168_v11, 0.0  ;;  %v2802_v10 = vpop.f32.mrb[44].mxu1  ;;  %3111 = vmatprep.subr.bf16.mxu0 %v3110_v9 }
 0x392   : > { %v1183_v16 = vadd.f32 %v2802_v10, %v1039_v8  ;;  %v1177_v17 = vpop.f32.mrb[45].mxu1  ;;  %3113 = vmatpush3.bf16.msra.mxu0 %v3110_v9  ;;  %v1274_v46 = vpop.permute.xlu1 %1273 }
 0x393   : > { %v3114_v18 = vpack.c.bf16 %v1207_v13, %v1206_v54  ;;  %v1178_v19 = vadd.f32 %v1177_v17, %v1034_v12  ;;  %v1279_v60 = vpop.permute.xlu0 %1278 }
 0x394   : > { %v1209_v20 = vmax.f32 %v1183_v16, 0.0 }
 0x395   : > { %v1208_v22 = vmax.f32 %v1178_v19, 0.0  ;;  %v2805_v23 = vpop.f32.mrb[46].mxu1  ;;  %3115 = vmatprep.subr.bf16.mxu0 %v3114_v18 }
 0x396   : > { %v1193_v25 = vadd.f32 %v2805_v23, %v1049_v21  ;;  %v1187_v59 = vpop.f32.mrb[47].mxu1  ;;  %3117 = vmatpush3.bf16.msra.mxu0 %v3114_v18  ;;  %v1284_v55 = vpop.permute.xlu1 %1283 }
 0x397   : > { %v3118_v15 = vpack.c.bf16 %v1209_v20, %v1208_v22  ;;  %v1188_v26 = vadd.f32 %v1187_v59, %v1044_v24  ;;  %v1289_v11 = vpop.permute.xlu0 %1288 }
 0x398   : > { %v1211_v27 = vmax.f32 %v1193_v25, 0.0 }
 0x399   : > { %v1210_v28 = vmax.f32 %v1188_v26, 0.0  ;;  %3119 = vmatprep.subr.bf16.mxu0 %v3118_v15 }
 0x39a   : > { %3121 = vmatpush3.bf16.msra.mxu0 %v3118_v15  ;;  %v1294_v7 = vpop.permute.xlu1 %1293 }
 0x39b   : > { %v3122_v29 = vpack.c.bf16 %v1211_v27, %v1210_v28  ;;  %v1299_v23 = vpop.permute.xlu0 %1298 }
 0x39d   : > { %3123 = vmatprep.subr.bf16.mxu0 %v3122_v29 }
 0x39e   : > { %3125 = vmatpush3.bf16.msra.mxu0 %v3122_v29  ;;  %v1304_v20 = vpop.permute.xlu1 %1303 }
 0x3a1   : > { %2839 = vmatmul.mubr.f32.vlgmr.msra.gmra.mrb[16].mxu0 %v2403_v30 }
 0x3a2   : > { %2841 = vmatprep.mubr.f32.mxu0 %v2404_v31  ;;  %v1314_v31 = vpop.permute.xlu1 %1313 }
 0x3a5   : > { %2842 = vmatmul.mubr.f32.gmra.mrb[18].mxu0 %v2405_v32 }
 0x3a6   : > { %2844 = vmatprep.mubr.f32.mxu0 %v2406_v58 }
 0x3a9   : > { %2845 = vmatmul.mubr.f32.gmra.mrb[20].mxu0 %v2407_v14  ;;  %v1309_v14 = vpop.permute.xlu0 %1308 }
 0x3aa   : > { %2847 = vmatprep.mubr.f32.mxu0 %v2408_v33 }
 0x3ad   : > { %2848 = vmatmul.mubr.f32.gmra.mrb[22].mxu0 %v2409_v34 }
 0x3ae   : > { %2850 = vmatprep.mubr.f32.mxu0 %v2410_v35 }
 0x3b1   : > { %2851 = vmatmul.mubr.f32.gmra.mrb[24].mxu0 %v2411_v36 }
 0x3b2   : > { %2853 = vmatprep.mubr.f32.mxu0 %v2412_v37 }
 0x3b5   : > { %2854 = vmatmul.mubr.f32.gmra.mrb[26].mxu0 %v2413_v38 }
 0x3b6   : > { %2856 = vmatprep.mubr.f32.mxu0 %v2414_v39 }
 0x3b9   : > { %2857 = vmatmul.mubr.f32.gmra.mrb[28].mxu0 %v2415_v40 }
 0x3ba   : > { %2859 = vmatprep.mubr.f32.mxu0 %v2416_v41  ;;  %v1324_v41 = vpop.permute.xlu1 %1323 }
 0x3bd   : > { %2860 = vmatmul.mubr.f32.gmra.mrb[30].mxu0 %v2417_v42 }
 0x474   : > { %v2840_v49 = vpop.f32.mrb[16].mxu0 }
 0x475   : > { %v1398_v50 = vadd.f32 %v2840_v49, %v1254_v0  ;;  %v1392_v51 = vpop.f32.mrb[17].mxu0  ;;  %v1319_v0 = vpop.permute.xlu0 %1318 }
 0x476   : > { %v1393_v52 = vadd.f32 %v1392_v51, %v1249_v1  ;;  %v2419_v51 = vld [vmem:[%s3964_s2 + $0x188] sm:$0xff] }
 0x477   : > { %v1472_v53 = vmax.f32 %v1398_v50, 0.0 }
 0x478   : > { %v1471_v56 = vmax.f32 %v1393_v52, 0.0  ;;  %v2843_v57 = vpop.f32.mrb[18].mxu0  ;;  %v2420_v52 = vld [vmem:[%s3964_s2 + $0x190] sm:$0xff] }
 0x479   : > { %v1408_v61 = vadd.f32 %v2843_v57, %v1264_v44  ;;  %v1402_v62 = vpop.f32.mrb[19].mxu0  ;;  %v2424_v57 = vld [vmem:[%s3964_s2 + $0x1b0] sm:$0xff] }
 0x47a   : > { %v3126_v63 = vpack.c.bf16 %v1472_v53, %v1471_v56  ;;  %v1403_v2 = vadd.f32 %v1402_v62, %v1259_v45  ;;  %v2421_v53 = vld [vmem:[%s3964_s2 + $0x198] sm:$0xff]  ;;  %v2423_v56 = vld [vmem:[%s3964_s2 + $0x1a8] sm:$0xff] }
 0x47b   : > { %v1474_v3 = vmax.f32 %v1408_v61, 0.0  ;;  %v2426_v61 = vld [vmem:[%s3964_s2 + $0x1c0] sm:$0xff]  ;;  %v2427_v62 = vld [vmem:[%s3964_s2 + $0x1c8] sm:$0xff] }
 0x47c   : > { %v1473_v4 = vmax.f32 %v1403_v2, 0.0  ;;  %v2846_v5 = vpop.f32.mrb[20].mxu0  ;;  %3127 = vmatprep.subr.bf16.mxu1 %v3126_v63  ;;  %v2429_v2 = vld [vmem:[%s3964_s2 + $0x1d8] sm:$0xff] }
 0x47d   : > { %v1418_v48 = vadd.f32 %v2846_v5, %v1274_v46  ;;  %v1412_v6 = vpop.f32.mrb[21].mxu0  ;;  %3129 = vmatpush3.bf16.msra.mxu1 %v3126_v63  ;;  %v2428_v63 = vld [vmem:[%s3964_s2 + $0x1d0] sm:$0xff] }
 0x47e   : > { %v3130_v8 = vpack.c.bf16 %v1474_v3, %v1473_v4  ;;  %v1413_v9 = vadd.f32 %v1412_v6, %v1269_v47  ;;  %v2430_v3 = vld [vmem:[%s3964_s2 + $0x1e0] sm:$0xff]  ;;  %v2431_v4 = vld [vmem:[%s3964_s2 + $0x1e8] sm:$0xff]  ;;  %v2432_v5 = vld [vmem:[%s3964_s2 + $0x1f0] sm:$0xff] }
 0x47f   : > { %v1476_v12 = vmax.f32 %v1418_v48, 0.0  ;;  %v2433_v48 = vld [vmem:[%s3964_s2 + $0x1f8] sm:$0xff]  ;;  %v1762_v6 = vld [vmem:[#allocation4] sm:$0xff] }
 0x480   : > { %v1475_v13 = vmax.f32 %v1413_v9, 0.0  ;;  %v2849_v54 = vpop.f32.mrb[22].mxu0  ;;  %3131 = vmatprep.subr.bf16.mxu1 %v3130_v8  ;;  %2950 = vmatprep.mubr.f32.mxu0 %v1762_v6 }
 0x481   : > { %v1428_v10 = vadd.f32 %v2849_v54, %v1284_v55  ;;  %v1422_v16 = vpop.f32.mrb[23].mxu0  ;;  %3133 = vmatpush3.bf16.msra.mxu1 %v3130_v8  ;;  %v2422_v55 = vld [vmem:[%s3964_s2 + $0x1a0] sm:$0xff]  ;;  %v1524_v8 = vpop.permute.xlu0 %1523 }
 0x482   : > { %v3134_v17 = vpack.c.bf16 %v1476_v12, %v1475_v13  ;;  %v1423_v18 = vadd.f32 %v1422_v16, %v1279_v60  ;;  %v2425_v60 = vld [vmem:[%s3964_s2 + $0x1b8] sm:$0xff] }
 0x483   : > { %v1478_v19 = vmax.f32 %v1428_v10, 0.0 }
 0x484   : > { %v1477_v21 = vmax.f32 %v1423_v18, 0.0  ;;  %v2852_v22 = vpop.f32.mrb[24].mxu0  ;;  %3135 = vmatprep.subr.bf16.mxu1 %v3134_v17 }
 0x485   : > { %v1438_v24 = vadd.f32 %v2852_v22, %v1294_v7  ;;  %v1432_v25 = vpop.f32.mrb[25].mxu0  ;;  %3137 = vmatpush3.bf16.msra.mxu1 %v3134_v17  ;;  %v1529_v7 = vpop.permute.xlu1 %1528 }
 0x486   : > { %v3138_v59 = vpack.c.bf16 %v1478_v19, %v1477_v21  ;;  %v1433_v15 = vadd.f32 %v1432_v25, %v1289_v11  ;;  %v1534_v11 = vpop.permute.xlu0 %1533 }
 0x487   : > { %v1480_v26 = vmax.f32 %v1438_v24, 0.0 }
 0x488   : > { %v1479_v27 = vmax.f32 %v1433_v15, 0.0  ;;  %v2855_v28 = vpop.f32.mrb[26].mxu0  ;;  %3139 = vmatprep.subr.bf16.mxu1 %v3138_v59 }
 0x489   : > { %v1448_v29 = vadd.f32 %v2855_v28, %v1304_v20  ;;  %v1442_v30 = vpop.f32.mrb[27].mxu0  ;;  %3141 = vmatpush3.bf16.msra.mxu1 %v3138_v59  ;;  %v1539_v9 = vpop.permute.xlu1 %1538 }
 0x48a   : > { %v3142_v32 = vpack.c.bf16 %v1480_v26, %v1479_v27  ;;  %v1443_v58 = vadd.f32 %v1442_v30, %v1299_v23  ;;  %v1544_v13 = vpop.permute.xlu0 %1543 }
 0x48b   : > { %v1482_v33 = vmax.f32 %v1448_v29, 0.0 }
 0x48c   : > { %v1481_v34 = vmax.f32 %v1443_v58, 0.0  ;;  %v2858_v35 = vpop.f32.mrb[28].mxu0  ;;  %3143 = vmatprep.subr.bf16.mxu1 %v3142_v32 }
 0x48d   : > { %v1458_v36 = vadd.f32 %v2858_v35, %v1314_v31  ;;  %v1452_v37 = vpop.f32.mrb[29].mxu0  ;;  %3145 = vmatpush3.bf16.msra.mxu1 %v3142_v32  ;;  %v1549_v12 = vpop.permute.xlu1 %1548 }
 0x48e   : > { %v3146_v38 = vpack.c.bf16 %v1482_v33, %v1481_v34  ;;  %v1453_v39 = vadd.f32 %v1452_v37, %v1309_v14  ;;  %v1554_v22 = vpop.permute.xlu0 %1553 }
 0x48f   : > { %v1484_v40 = vmax.f32 %v1458_v36, 0.0 }
 0x490   : > { %v1483_v42 = vmax.f32 %v1453_v39, 0.0  ;;  %v2861_v43 = vpop.f32.mrb[30].mxu0  ;;  %3147 = vmatprep.subr.bf16.mxu1 %v3146_v38 }
 0x491   : > { %v1468_v1 = vadd.f32 %v2861_v43, %v1324_v41  ;;  %v1462_v44 = vpop.f32.mrb[31].mxu0  ;;  %3149 = vmatpush3.bf16.msra.mxu1 %v3146_v38  ;;  %v1559_v19 = vpop.permute.xlu1 %1558 }
 0x492   : > { %v3150_v45 = vpack.c.bf16 %v1484_v40, %v1483_v42  ;;  %v1463_v46 = vadd.f32 %v1462_v44, %v1319_v0  ;;  %v1564_v58 = vpop.permute.xlu0 %1563 }
 0x493   : > { %v1486_v47 = vmax.f32 %v1468_v1, 0.0 }
 0x494   : > { %v1485_v49 = vmax.f32 %v1463_v46, 0.0  ;;  %3151 = vmatprep.subr.bf16.mxu1 %v3150_v45 }
 0x495   : > { %3153 = vmatpush3.bf16.msra.mxu1 %v3150_v45  ;;  %v1569_v30 = vpop.permute.xlu1 %1568 }
 0x496   : > { %v3154_v50 = vpack.c.bf16 %v1486_v47, %v1485_v49  ;;  %v1574_v43 = vpop.permute.xlu0 %1573 }
 0x498   : > { %3155 = vmatprep.subr.bf16.mxu1 %v3154_v50 }
 0x499   : > { %3157 = vmatpush3.bf16.msra.mxu1 %v3154_v50  ;;  %v1579_v40 = vpop.permute.xlu1 %1578 }
 0x49c   : > { %2895 = vmatmul.mubr.f32.vlgmr.msra.gmra.mrb[48].mxu1 %v2419_v51 }
 0x49d   : > { %2897 = vmatprep.mubr.f32.mxu1 %v2420_v52  ;;  %v1589_v52 = vpop.permute.xlu1 %1588 }
 0x4a0   : > { %2898 = vmatmul.mubr.f32.gmra.mrb[50].mxu1 %v2421_v53 }
 0x4a1   : > { %2900 = vmatprep.mubr.f32.mxu1 %v2422_v55 }
 0x4a4   : > { %2901 = vmatmul.mubr.f32.gmra.mrb[52].mxu1 %v2423_v56  ;;  %v1584_v56 = vpop.permute.xlu0 %1583 }
 0x4a5   : > { %2903 = vmatprep.mubr.f32.mxu1 %v2424_v57 }
 0x4a8   : > { %2904 = vmatmul.mubr.f32.gmra.mrb[54].mxu1 %v2425_v60 }
 0x4a9   : > { %2906 = vmatprep.mubr.f32.mxu1 %v2426_v61 }
 0x4ac   : > { %2907 = vmatmul.mubr.f32.gmra.mrb[56].mxu1 %v2427_v62 }
 0x4ad   : > { %2909 = vmatprep.mubr.f32.mxu1 %v2428_v63 }
 0x4b0   : > { %2910 = vmatmul.mubr.f32.gmra.mrb[58].mxu1 %v2429_v2 }
 0x4b1   : > { %2912 = vmatprep.mubr.f32.mxu1 %v2430_v3 }
 0x4b4   : > { %2913 = vmatmul.mubr.f32.gmra.mrb[60].mxu1 %v2431_v4 }
 0x4b5   : > { %2915 = vmatprep.mubr.f32.mxu1 %v2432_v5  ;;  %v1599_v5 = vpop.permute.xlu1 %1598 }
 0x4b8   : > { %2916 = vmatmul.mubr.f32.gmra.mrb[62].mxu1 %v2433_v48 }
 0x56f   : > { %v2896_v54 = vpop.f32.mrb[48].mxu1 }
 0x570   : > { %v1673_v10 = vadd.f32 %v2896_v54, %v1529_v7  ;;  %v1667_v16 = vpop.f32.mrb[49].mxu1  ;;  %v1594_v7 = vpop.permute.xlu0 %1593 }
 0x571   : > { %v1668_v17 = vadd.f32 %v1667_v16, %v1524_v8  ;;  %v1763_v16 = vld [vmem:[#allocation4 + $0x8] sm:$0xff] }
 0x572   : > { %v1747_v18 = vmax.f32 %v1673_v10, 0.0 }
 0x573   : > { %v1746_v20 = vmax.f32 %v1668_v17, 0.0  ;;  %v2899_v21 = vpop.f32.mrb[50].mxu1  ;;  %v1764_v17 = vld [vmem:[#allocation4 + $0x10] sm:$0xff] }
 0x574   : > { %v1683_v23 = vadd.f32 %v2899_v21, %v1539_v9  ;;  %v1677_v24 = vpop.f32.mrb[51].mxu1  ;;  %v1768_v21 = vld [vmem:[#allocation4 + $0x30] sm:$0xff] }
 0x575   : > { %v3158_v25 = vpack.c.bf16 %v1747_v18, %v1746_v20  ;;  %v1678_v59 = vadd.f32 %v1677_v24, %v1534_v11  ;;  %v1765_v18 = vld [vmem:[#allocation4 + $0x18] sm:$0xff]  ;;  %v1767_v20 = vld [vmem:[#allocation4 + $0x28] sm:$0xff] }
 0x576   : > { %v1749_v15 = vmax.f32 %v1683_v23, 0.0  ;;  %v1770_v23 = vld [vmem:[#allocation4 + $0x40] sm:$0xff]  ;;  %v1771_v24 = vld [vmem:[#allocation4 + $0x48] sm:$0xff] }
 0x577   : > { %v1748_v26 = vmax.f32 %v1678_v59, 0.0  ;;  %v2902_v27 = vpop.f32.mrb[52].mxu1  ;;  %3159 = vmatprep.subr.bf16.mxu0 %v3158_v25  ;;  %v1773_v59 = vld [vmem:[#allocation4 + $0x58] sm:$0xff] }
 0x578   : > { %v1693_v28 = vadd.f32 %v2902_v27, %v1549_v12  ;;  %v1687_v29 = vpop.f32.mrb[53].mxu1  ;;  %3161 = vmatpush3.bf16.msra.mxu0 %v3158_v25  ;;  %v1772_v25 = vld [vmem:[#allocation4 + $0x50] sm:$0xff] }
 0x579   : > { %v3162_v31 = vpack.c.bf16 %v1749_v15, %v1748_v26  ;;  %v1688_v32 = vadd.f32 %v1687_v29, %v1544_v13  ;;  %v1774_v15 = vld [vmem:[#allocation4 + $0x60] sm:$0xff]  ;;  %v1775_v26 = vld [vmem:[#allocation4 + $0x68] sm:$0xff]  ;;  %v1776_v27 = vld [vmem:[#allocation4 + $0x70] sm:$0xff] }
 0x57a   : > { %v1751_v14 = vmax.f32 %v1693_v28, 0.0  ;;  %v1777_v28 = vld [vmem:[#allocation4 + $0x78] sm:$0xff]  ;;  %v1778_v29 = vld [vmem:[#allocation4 + $0x80] sm:$0xff] }
 0x57b   : > { %v1750_v33 = vmax.f32 %v1688_v32, 0.0  ;;  %v2905_v34 = vpop.f32.mrb[54].mxu1  ;;  %3163 = vmatprep.subr.bf16.mxu0 %v3162_v31  ;;  %v1781_v32 = vld [vmem:[#allocation4 + $0x98] sm:$0xff] }
 0x57c   : > { %v1703_v35 = vadd.f32 %v2905_v34, %v1559_v19  ;;  %v1697_v36 = vpop.f32.mrb[55].mxu1  ;;  %3165 = vmatpush3.bf16.msra.mxu0 %v3162_v31  ;;  %v1766_v19 = vld [vmem:[#allocation4 + $0x20] sm:$0xff]  ;;  %v1780_v31 = vld [vmem:[#allocation4 + $0x90] sm:$0xff]  ;;  %v1785_v34 = vld [vmem:[#allocation4 + $0xb8] sm:$0xff] }
 0x57d   : > { %v3166_v37 = vpack.c.bf16 %v1751_v14, %v1750_v33  ;;  %v1698_v38 = vadd.f32 %v1697_v36, %v1554_v22  ;;  %v1769_v22 = vld [vmem:[#allocation4 + $0x38] sm:$0xff]  ;;  %v1783_v14 = vld [vmem:[#allocation4 + $0xa8] sm:$0xff]  ;;  %v1784_v33 = vld [vmem:[#allocation4 + $0xb0] sm:$0xff] }
 0x57e   : > { %v1753_v39 = vmax.f32 %v1703_v35, 0.0  ;;  %v1786_v35 = vld [vmem:[#allocation4 + $0xc0] sm:$0xff]  ;;  %v1787_v36 = vld [vmem:[#allocation4 + $0xc8] sm:$0xff] }
 0x57f   : > { %v1752_v41 = vmax.f32 %v1698_v38, 0.0  ;;  %v2908_v42 = vpop.f32.mrb[56].mxu1  ;;  %3167 = vmatprep.subr.bf16.mxu0 %v3166_v37  ;;  %v1789_v38 = vld [vmem:[#allocation4 + $0xd8] sm:$0xff] }
 0x580   : > { %v1713_v0 = vadd.f32 %v2908_v42, %v1569_v30  ;;  %v1707_v1 = vpop.f32.mrb[57].mxu1  ;;  %3169 = vmatpush3.bf16.msra.mxu0 %v3166_v37  ;;  %v1779_v30 = vld [vmem:[#allocation4 + $0x88] sm:$0xff]  ;;  %v1788_v37 = vld [vmem:[#allocation4 + $0xd0] sm:$0xff]  ;;  %v1793_v42 = vld [vmem:[#allocation4 + $0xf8] sm:$0xff] }
 0x581   : > { %v3170_v44 = vpack.c.bf16 %v1753_v39, %v1752_v41  ;;  %v1708_v45 = vadd.f32 %v1707_v1, %v1564_v58  ;;  %v1782_v58 = vld [vmem:[#allocation4 + $0xa0] sm:$0xff]  ;;  %v1792_v41 = vld [vmem:[#allocation4 + $0xf0] sm:$0xff] }
 0x582   : > { %v1755_v46 = vmax.f32 %v1713_v0, 0.0  ;;  %v1790_v39 = vld [vmem:[#allocation4 + $0xe0] sm:$0xff]  ;;  %v1829_v0 = vpop.permute.xlu0 %1828 }
 0x583   : > { %v1754_v47 = vmax.f32 %v1708_v45, 0.0  ;;  %v2911_v49 = vpop.f32.mrb[58].mxu1  ;;  %3171 = vmatprep.subr.bf16.mxu0 %v3170_v44 }
 0x584   : > { %v1723_v50 = vadd.f32 %v2911_v49, %v1579_v40  ;;  %v1717_v51 = vpop.f32.mrb[59].mxu1  ;;  %3173 = vmatpush3.bf16.msra.mxu0 %v3170_v44  ;;  %v1791_v40 = vld [vmem:[#allocation4 + $0xe8] sm:$0xff] }
 0x585   : > { %v3174_v53 = vpack.c.bf16 %v1755_v46, %v1754_v47  ;;  %v1718_v55 = vadd.f32 %v1717_v51, %v1574_v43  ;;  %v1834_v43 = vpop.permute.xlu1 %1833 }
 0x586   : > { %v1757_v57 = vmax.f32 %v1723_v50, 0.0  ;;  %v1839_v44 = vpop.permute.xlu0 %1838 }
 0x587   : > { %v1756_v60 = vmax.f32 %v1718_v55, 0.0  ;;  %v2914_v61 = vpop.f32.mrb[60].mxu1  ;;  %3175 = vmatprep.subr.bf16.mxu0 %v3174_v53 }
 0x588   : > { %v1733_v62 = vadd.f32 %v2914_v61, %v1589_v52  ;;  %v1727_v63 = vpop.f32.mrb[61].mxu1  ;;  %3177 = vmatpush3.bf16.msra.mxu0 %v3174_v53 }
 0x589   : > { %v3178_v2 = vpack.c.bf16 %v1757_v57, %v1756_v60  ;;  %v1728_v3 = vadd.f32 %v1727_v63, %v1584_v56  ;;  %v1844_v1 = vpop.permute.xlu1 %1843 }
 0x58a   : > { %v1759_v4 = vmax.f32 %v1733_v62, 0.0  ;;  %v1849_v46 = vpop.permute.xlu0 %1848 }
 0x58b   : > { %v1758_v48 = vmax.f32 %v1728_v3, 0.0  ;;  %v2917_v6 = vpop.f32.mrb[62].mxu1  ;;  %3179 = vmatprep.subr.bf16.mxu0 %v3178_v2 }
 0x58c   : > { %v1743_v8 = vadd.f32 %v2917_v6, %v1599_v5  ;;  %v1737_v9 = vpop.f32.mrb[63].mxu1  ;;  %3181 = vmatpush3.bf16.msra.mxu0 %v3178_v2 }
 0x58d   : > { %v3182_v11 = vpack.c.bf16 %v1759_v4, %v1758_v48  ;;  %v1738_v12 = vadd.f32 %v1737_v9, %v1594_v7  ;;  %v1854_v45 = vpop.permute.xlu1 %1853 }
 0x58e   : > { %v1761_v13 = vmax.f32 %v1743_v8, 0.0  ;;  %v1859_v49 = vpop.permute.xlu0 %1858 }
 0x58f   : > { %v1760_v54 = vmax.f32 %v1738_v12, 0.0  ;;  %3183 = vmatprep.subr.bf16.mxu0 %v3182_v11 }
 0x590   : > { %3185 = vmatpush3.bf16.msra.mxu0 %v3182_v11 }
 0x591   : > { %v3186_v10 = vpack.c.bf16 %v1761_v13, %v1760_v54  ;;  %v1864_v47 = vpop.permute.xlu1 %1863 }
 0x592   : > { %v1869_v51 = vpop.permute.xlu0 %1868 }
 0x593   : > { %3187 = vmatprep.subr.bf16.mxu0 %v3186_v10 }
 0x594   : > { %3189 = vmatpush3.bf16.msra.mxu0 %v3186_v10 }
 0x595   : > { %v1874_v50 = vpop.permute.xlu1 %1873 }
 0x596   : > { %v1879_v55 = vpop.permute.xlu0 %1878 }
 0x597   : > { %2951 = vmatmul.mubr.f32.vlgmr.msra.gmra.mrb[32].mxu0 %v1763_v16 }
 0x598   : > { %2953 = vmatprep.mubr.f32.mxu0 %v1764_v17 }
 0x599   : > { %v1884_v52 = vpop.permute.xlu1 %1883 }
 0x59a   : > { %v1889_v4 = vpop.permute.xlu0 %1888 }
 0x59b   : > { %2954 = vmatmul.mubr.f32.gmra.mrb[34].mxu0 %v1765_v18 }
 0x59c   : > { %2956 = vmatprep.mubr.f32.mxu0 %v1766_v19 }
 0x59d   : > { %v1894_v2 = vpop.permute.xlu1 %1893 }
 0x59e   : > { %v1899_v11 = vpop.permute.xlu0 %1898 }
 0x59f   : > { %2957 = vmatmul.mubr.f32.gmra.mrb[36].mxu0 %v1767_v20 }
 0x5a0   : > { %2959 = vmatprep.mubr.f32.mxu0 %v1768_v21 }
 0x5a1   : > { %v1904_v8 = vpop.permute.xlu1 %1903 }
 0x5a2   : > { %v1909_v20 = vpop.permute.xlu0 %1908 }
 0x5a3   : > { %2960 = vmatmul.mubr.f32.gmra.mrb[38].mxu0 %v1769_v22 }
 0x5a4   : > { %2962 = vmatprep.mubr.f32.mxu0 %v1770_v23 }
 0x5a5   : > { %v1914_v18 = vpop.permute.xlu1 %1913 }
 0x5a7   : > { %2963 = vmatmul.mubr.f32.gmra.mrb[40].mxu0 %v1771_v24 }
 0x5a8   : > { %2965 = vmatprep.mubr.f32.mxu0 %v1772_v25 }
 0x5a9   : > { %v1924_v25 = vpop.permute.xlu1 %1923 }
 0x5ab   : > { %2966 = vmatmul.mubr.f32.gmra.mrb[42].mxu0 %v1773_v59 }
 0x5ac   : > { %2968 = vmatprep.mubr.f32.mxu0 %v1774_v15  ;;  %v1919_v15 = vpop.permute.xlu0 %1918 }
 0x5af   : > { %2969 = vmatmul.mubr.f32.gmra.mrb[44].mxu0 %v1775_v26 }
 0x5b0   : > { %2971 = vmatprep.mubr.f32.mxu0 %v1776_v27 }
 0x5b3   : > { %2972 = vmatmul.mubr.f32.gmra.mrb[46].mxu0 %v1777_v28 }
 0x5b4   : > { %2974 = vmatprep.mubr.f32.mxu0 %v1778_v29 }
 0x5b7   : > { %2975 = vmatmul.mubr.f32.gmra.mrb[48].mxu0 %v1779_v30 }
 0x5b8   : > { %2977 = vmatprep.mubr.f32.mxu0 %v1780_v31 }
 0x5bb   : > { %2978 = vmatmul.mubr.f32.gmra.mrb[50].mxu0 %v1781_v32  ;;  %v1934_v32 = vpop.permute.xlu1 %1933 }
 0x5bc   : > { %2980 = vmatprep.mubr.f32.mxu0 %v1782_v58 }
 0x5bf   : > { %2981 = vmatmul.mubr.f32.gmra.mrb[52].mxu0 %v1783_v14  ;;  %v1929_v14 = vpop.permute.xlu0 %1928 }
 0x5c0   : > { %2983 = vmatprep.mubr.f32.mxu0 %v1784_v33 }
 0x5c3   : > { %2984 = vmatmul.mubr.f32.gmra.mrb[54].mxu0 %v1785_v34 }
 0x5c4   : > { %2986 = vmatprep.mubr.f32.mxu0 %v1786_v35 }
 0x5c7   : > { %2987 = vmatmul.mubr.f32.gmra.mrb[56].mxu0 %v1787_v36 }
 0x5c8   : > { %2989 = vmatprep.mubr.f32.mxu0 %v1788_v37  ;;  %v1944_v37 = vpop.permute.xlu1 %1943 }
 0x5cb   : > { %2990 = vmatmul.mubr.f32.gmra.mrb[58].mxu0 %v1789_v38 }
 0x5cc   : > { %2992 = vmatprep.mubr.f32.mxu0 %v1790_v39  ;;  %v1939_v39 = vpop.permute.xlu0 %1938 }
 0x5cf   : > { %2993 = vmatmul.mubr.f32.gmra.mrb[60].mxu0 %v1791_v40 }
 0x5d0   : > { %2995 = vmatprep.mubr.f32.mxu0 %v1792_v41 }
 0x5d3   : > { %2996 = vmatmul.mubr.f32.gmra.mrb[62].mxu0 %v1793_v42 }
 0x66a   : > { %v2952_v53 = vpop.f32.mrb[32].mxu0 }
 0x66b   : > { %v2058_v56 = vadd.f32 %v2952_v53, %v1834_v43  ;;  %v2052_v57 = vpop.f32.mrb[33].mxu0 }
 0x66c   : > { %v2053_v60 = vadd.f32 %v2052_v57, %v1829_v0 }
 0x66d   : > { %2213 = vst.msk [vmem:[%s3887_s29 + $0x8] sm:$0xff] %vm2211_vm0, %v2058_v56 }
 0x66e   : > { %2212 = vst.msk [vmem:[%s3887_s29] sm:$0xff] %vm2211_vm0, %v2053_v60  ;;  %v2955_v61 = vpop.f32.mrb[34].mxu0 }
 0x66f   : > { %v2068_v62 = vadd.f32 %v2955_v61, %v1844_v1  ;;  %v2062_v63 = vpop.f32.mrb[35].mxu0 }
 0x670   : > { %v2063_v3 = vadd.f32 %v2062_v63, %v1839_v44  ;;  %v1954_v44 = vpop.permute.xlu1 %1953 }
 0x671   : > { %2215 = vst.msk [vmem:[%s3887_s29 + $0x18] sm:$0xff] %vm2211_vm0, %v2068_v62 }
 0x672   : > { %2214 = vst.msk [vmem:[%s3887_s29 + $0x10] sm:$0xff] %vm2211_vm0, %v2063_v3  ;;  %v2958_v5 = vpop.f32.mrb[36].mxu0 }
 0x673   : > { %v2078_v48 = vadd.f32 %v2958_v5, %v1854_v45  ;;  %v2072_v6 = vpop.f32.mrb[37].mxu0 }
 0x674   : > { %v2073_v7 = vadd.f32 %v2072_v6, %v1849_v46  ;;  %v1949_v46 = vpop.permute.xlu0 %1948 }
 0x675   : > { %2217 = vst.msk [vmem:[%s3887_s29 + $0x28] sm:$0xff] %vm2211_vm0, %v2078_v48 }
 0x676   : > { %2216 = vst.msk [vmem:[%s3887_s29 + $0x20] sm:$0xff] %vm2211_vm0, %v2073_v7  ;;  %v2961_v9 = vpop.f32.mrb[38].mxu0 }
 0x677   : > { %v2088_v12 = vadd.f32 %v2961_v9, %v1864_v47  ;;  %v2082_v13 = vpop.f32.mrb[39].mxu0 }
 0x678   : > { %v2083_v54 = vadd.f32 %v2082_v13, %v1859_v49 }
 0x679   : > { %2219 = vst.msk [vmem:[%s3887_s29 + $0x38] sm:$0xff] %vm2211_vm0, %v2088_v12 }
 0x67a   : > { %2218 = vst.msk [vmem:[%s3887_s29 + $0x30] sm:$0xff] %vm2211_vm0, %v2083_v54  ;;  %v2964_v10 = vpop.f32.mrb[40].mxu0 }
 0x67b   : > { %v2098_v16 = vadd.f32 %v2964_v10, %v1874_v50  ;;  %v2092_v17 = vpop.f32.mrb[41].mxu0 }
 0x67c   : > { %v2093_v19 = vadd.f32 %v2092_v17, %v1869_v51 }
 0x67d   : > { %2221 = vst.msk [vmem:[%s3887_s29 + $0x48] sm:$0xff] %vm2211_vm0, %v2098_v16 }
 0x67e   : > { %2220 = vst.msk [vmem:[%s3887_s29 + $0x40] sm:$0xff] %vm2211_vm0, %v2093_v19  ;;  %v2967_v21 = vpop.f32.mrb[42].mxu0 }
 0x67f   : > { %v2108_v22 = vadd.f32 %v2967_v21, %v1884_v52  ;;  %v2102_v23 = vpop.f32.mrb[43].mxu0  ;;  %v1964_v52 = vpop.permute.xlu1 %1963 }
 0x680   : > { %v2103_v24 = vadd.f32 %v2102_v23, %v1879_v55  ;;  %v1959_v55 = vpop.permute.xlu0 %1958 }
 0x681   : > { %2223 = vst.msk [vmem:[%s3887_s29 + $0x58] sm:$0xff] %vm2211_vm0, %v2108_v22 }
 0x682   : > { %2222 = vst.msk [vmem:[%s3887_s29 + $0x50] sm:$0xff] %vm2211_vm0, %v2103_v24  ;;  %v2970_v59 = vpop.f32.mrb[44].mxu0 }
 0x683   : > { %v2118_v26 = vadd.f32 %v2970_v59, %v1894_v2  ;;  %v2112_v27 = vpop.f32.mrb[45].mxu0  ;;  %v1974_v2 = vpop.permute.xlu1 %1973 }
 0x684   : > { %v2113_v28 = vadd.f32 %v2112_v27, %v1889_v4  ;;  %v1969_v4 = vpop.permute.xlu0 %1968 }
 0x685   : > { %2225 = vst.msk [vmem:[%s3887_s29 + $0x68] sm:$0xff] %vm2211_vm0, %v2118_v26 }
 0x686   : > { %2224 = vst.msk [vmem:[%s3887_s29 + $0x60] sm:$0xff] %vm2211_vm0, %v2113_v28  ;;  %v2973_v29 = vpop.f32.mrb[46].mxu0 }
 0x687   : > { %v2128_v30 = vadd.f32 %v2973_v29, %v1904_v8  ;;  %v2122_v31 = vpop.f32.mrb[47].mxu0  ;;  %v1984_v8 = vpop.permute.xlu1 %1983 }
 0x688   : > { %v2123_v58 = vadd.f32 %v2122_v31, %v1899_v11  ;;  %v1979_v11 = vpop.permute.xlu0 %1978 }
 0x689   : > { %2227 = vst.msk [vmem:[%s3887_s29 + $0x78] sm:$0xff] %vm2211_vm0, %v2128_v30 }
 0x68a   : > { %2226 = vst.msk [vmem:[%s3887_s29 + $0x70] sm:$0xff] %vm2211_vm0, %v2123_v58  ;;  %v2976_v33 = vpop.f32.mrb[48].mxu0 }
 0x68b   : > { %v2138_v34 = vadd.f32 %v2976_v33, %v1914_v18  ;;  %v2132_v35 = vpop.f32.mrb[49].mxu0 }
 0x68c   : > { %v2133_v36 = vadd.f32 %v2132_v35, %v1909_v20 }
 0x68d   : > { %2229 = vst.msk [vmem:[%s3887_s29 + $0x88] sm:$0xff] %vm2211_vm0, %v2138_v34 }
 0x68e   : > { %2228 = vst.msk [vmem:[%s3887_s29 + $0x80] sm:$0xff] %vm2211_vm0, %v2133_v36  ;;  %v2979_v38 = vpop.f32.mrb[50].mxu0 }
 0x68f   : > { %v2148_v40 = vadd.f32 %v2979_v38, %v1924_v25  ;;  %v2142_v41 = vpop.f32.mrb[51].mxu0 }
 0x690   : > { %v2143_v42 = vadd.f32 %v2142_v41, %v1919_v15 }
 0x691   : > { %2231 = vst.msk [vmem:[%s3887_s29 + $0x98] sm:$0xff] %vm2211_vm0, %v2148_v40 }
 0x692   : > { %2230 = vst.msk [vmem:[%s3887_s29 + $0x90] sm:$0xff] %vm2211_vm0, %v2143_v42  ;;  %v2982_v43 = vpop.f32.mrb[52].mxu0 }
 0x693   : > { %v2158_v0 = vadd.f32 %v2982_v43, %v1934_v32  ;;  %v2152_v1 = vpop.f32.mrb[53].mxu0 }
 0x694   : > { %v2153_v45 = vadd.f32 %v2152_v1, %v1929_v14 }
 0x695   : > { %2233 = vst.msk [vmem:[%s3887_s29 + $0xa8] sm:$0xff] %vm2211_vm0, %v2158_v0 }
 0x696   : > { %2232 = vst.msk [vmem:[%s3887_s29 + $0xa0] sm:$0xff] %vm2211_vm0, %v2153_v45  ;;  %v2985_v47 = vpop.f32.mrb[54].mxu0 }
 0x697   : > { %v2168_v49 = vadd.f32 %v2985_v47, %v1944_v37  ;;  %v2162_v50 = vpop.f32.mrb[55].mxu0 }
 0x698   : > { %v2163_v51 = vadd.f32 %v2162_v50, %v1939_v39 }
 0x699   : > { %2235 = vst.msk [vmem:[%s3887_s29 + $0xb8] sm:$0xff] %vm2211_vm0, %v2168_v49 }
 0x69a   : > { %2234 = vst.msk [vmem:[%s3887_s29 + $0xb0] sm:$0xff] %vm2211_vm0, %v2163_v51  ;;  %v2988_v53 = vpop.f32.mrb[56].mxu0 }
 0x69b   : > { %v2178_v56 = vadd.f32 %v2988_v53, %v1954_v44  ;;  %v2172_v57 = vpop.f32.mrb[57].mxu0 }
 0x69c   : > { %v2173_v60 = vadd.f32 %v2172_v57, %v1949_v46 }
 0x69d   : > { %2237 = vst.msk [vmem:[%s3887_s29 + $0xc8] sm:$0xff] %vm2211_vm0, %v2178_v56 }
 0x69e   : > { %2236 = vst.msk [vmem:[%s3887_s29 + $0xc0] sm:$0xff] %vm2211_vm0, %v2173_v60  ;;  %v2991_v61 = vpop.f32.mrb[58].mxu0 }
 0x69f   : > { %v2188_v62 = vadd.f32 %v2991_v61, %v1964_v52  ;;  %v2182_v63 = vpop.f32.mrb[59].mxu0 }
 0x6a0   : > { %v2183_v3 = vadd.f32 %v2182_v63, %v1959_v55 }
 0x6a1   : > { %2239 = vst.msk [vmem:[%s3887_s29 + $0xd8] sm:$0xff] %vm2211_vm0, %v2188_v62 }
 0x6a2   : > { %2238 = vst.msk [vmem:[%s3887_s29 + $0xd0] sm:$0xff] %vm2211_vm0, %v2183_v3  ;;  %v2994_v5 = vpop.f32.mrb[60].mxu0 }
 0x6a3   : > { %v2198_v48 = vadd.f32 %v2994_v5, %v1974_v2  ;;  %v2192_v6 = vpop.f32.mrb[61].mxu0 }
 0x6a4   : > { %v2193_v7 = vadd.f32 %v2192_v6, %v1969_v4 }
 0x6a5   : > { %2241 = vst.msk [vmem:[%s3887_s29 + $0xe8] sm:$0xff] %vm2211_vm0, %v2198_v48 }
 0x6a6   : > { %2240 = vst.msk [vmem:[%s3887_s29 + $0xe0] sm:$0xff] %vm2211_vm0, %v2193_v7  ;;  %v2997_v9 = vpop.f32.mrb[62].mxu0 }
 0x6a7   : > { %v2208_v12 = vadd.f32 %v2997_v9, %v1984_v8  ;;  %v2202_v13 = vpop.f32.mrb[63].mxu0 }
 0x6a8   : > { %v2203_v54 = vadd.f32 %v2202_v13, %v1979_v11 }
 0x6a9   : > { %2243 = vst.msk [vmem:[%s3887_s29 + $0xf8] sm:$0xff] %vm2211_vm0, %v2208_v12 }
 0x6aa   : > { %2242 = vst.msk [vmem:[%s3887_s29 + $0xf0] sm:$0xff] %vm2211_vm0, %v2203_v54 }
 0x6ab PF: > { %s19_s23 = sadd.s32 1, %s3424_s23   ;;  %s3985_s21 = smov %s3420_s22 }
 0x6ac   : > { %p16_p2 = scmp.ge.s32.totalorder %s19_s23, 4   ;;  %s3986_s22 = smov %s3988_s30 }
 0x6ae   :  { %18 = sbr.rel (!%p16_p2) target bundleno = 4 (0x4), region = 98 }
 0x6b5   :  { %2271 = vsyncpa [#allocation3], 1 }
 0x6b6   :  { %2273 = vsyncpa [#allocation3 + $0x1], 1 }
 0x6b7   :  { %2274 = vsyncpa [#allocation5], 1 }
 0x6b8   :  { %2275 = vsyncpa [#allocation8], 1 }

</bundles_post_ra>
